<compile_context>
chip_gen: v7x
topology: tpu7x:2x2x1
jax: 0.10.0
libtpu: 0.0.40
codegen_flags: <defaults>
</compile_context>

<pallas_src>
import jax
import jax.numpy as jnp
from jax.experimental import pallas as pl
from jax.experimental.pallas import tpu as pltpu


# ----------------------------------------------------------------------------
# Init-time helpers (plain JAX, executed once at model construction).
# ----------------------------------------------------------------------------
def _im2col(x, K, stride, padding):
    """Patch extraction for NCHW input. Column order = (Cin, kh, kw), matching
    PyTorch's Conv2d weight.reshape(Cout, Cin*K*K)."""
    N, C, H, W = x.shape
    xp = jnp.pad(x, ((0, 0), (0, 0), (padding, padding), (padding, padding)))
    Hout = (H + 2 * padding - K) // stride + 1
    Wout = (W + 2 * padding - K) // stride + 1
    cols = []
    for kh in range(K):
        for kw in range(K):
            cols.append(
                xp[:, :, kh:kh + stride * Hout:stride, kw:kw + stride * Wout:stride]
            )                                           # (N, C, Hout, Wout)
    p = jnp.stack(cols, axis=2)                         # (N, C, K*K, Hout, Wout)
    p = jnp.transpose(p, (0, 3, 4, 1, 2))               # (N, Hout, Wout, C, K*K)
    return p.reshape(N * Hout * Wout, C * K * K), Hout, Wout


def _conv_as_dense_matrix(w, H, W, stride, padding):
    """Unfold a Conv2d into a dense matrix M of shape (Cin*H*W, Cout*Hout*Wout)
    such that, for NCHW input x:  conv2d(x, w).reshape(N,-1) == x.reshape(N,-1) @ M."""
    Cout, Cin, K, _ = w.shape
    D = Cin * H * W
    eye = jnp.eye(D, dtype=jnp.float32).reshape(D, Cin, H, W)
    patches, Ho, Wo = _im2col(eye, K, stride, padding)              # (D*Ho*Wo, Cin*K*K)
    y = jnp.dot(patches, w.reshape(Cout, -1).T,
                precision=jax.lax.Precision.HIGHEST)                # (D*Ho*Wo, Cout)
    y = y.reshape(D, Ho, Wo, Cout).transpose(0, 3, 1, 2)            # (D, Cout, Ho, Wo)
    return y.reshape(D, Cout * Ho * Wo), Ho, Wo


# ----------------------------------------------------------------------------
# The fused Pallas kernel: chain of  h = [relu](h @ W [+ b])  stages.
# Matmuls run bf16 x bf16 -> f32 accumulate; bias/ReLU applied in f32.
# ----------------------------------------------------------------------------
def _make_fused_kernel(layer_meta, compute_dtype=jnp.bfloat16):
    """layer_meta: tuple of (has_bias, relu) per layer, in order."""
    n_layers = len(layer_meta)

    def kernel(*refs):
        x_ref = refs[0]
        o_ref = refs[-1]
        h = x_ref[...]                                   # (TM, 1024) bf16
        idx = 1
        for li, (has_bias, relu) in enumerate(layer_meta):
            w = refs[idx][...]                           # bf16 weight, VMEM-resident
            idx += 1
            acc = jnp.dot(h, w, preferred_element_type=jnp.float32)
            if has_bias:
                acc = acc + refs[idx][...]               # (1, N) f32, broadcasts over rows
                idx += 1
            if relu:
                acc = jnp.maximum(acc, 0.0)
            h = acc if li == n_layers - 1 else acc.astype(compute_dtype)
        o_ref[...] = h.astype(o_ref.dtype)
    return kernel


_TM_MAX = 256          # rows per grid tile at large batch (lane/sublane friendly)
_SUBLANE_PAD = 16      # minimum / small-batch row padding (bf16 sublane packing)


def _build_fused_forward(layers, out_size):
    """layers: list of (W (K,N) bf16, bias (1,N) f32 or None, relu bool)."""
    layer_meta = tuple((b is not None, relu) for _, b, relu in layers)
    kernel = _make_fused_kernel(layer_meta)

    flat_params = []
    for w, b, _ in layers:
        flat_params.append(w)
        if b is not None:
            flat_params.append(b)
    flat_params = tuple(flat_params)

    in_dim = int(layers[0][0].shape[0])
    n_out_padded = int(layers[-1][0].shape[1])
    weight_bytes = sum(int(p.size) * p.dtype.itemsize for p in flat_params)
    matmul_macs = sum(int(w.shape[0]) * int(w.shape[1]) for w, _, _ in layers)

    def forward(x):                                 # x: (N, C, H, W) float32, NCHW
        m = x.shape[0]
        # Batch bucketing: >=16-row pads at small m, 256-row tiles at large m.
        if m >= _TM_MAX:
            tm = _TM_MAX
        else:
            tm = max(_SUBLANE_PAD, ((m + _SUBLANE_PAD - 1) // _SUBLANE_PAD) * _SUBLANE_PAD)
        padded_m = ((m + tm - 1) // tm) * tm

        a0 = x.reshape(m, -1).astype(jnp.bfloat16)  # NCHW flatten matches dense matrices
        if padded_m != m:
            a0 = jnp.pad(a0, ((0, padded_m - m), (0, 0)))

        in_specs = [pl.BlockSpec((tm, in_dim), lambda i: (i, 0))]
        for w, b, _ in layers:
            in_specs.append(pl.BlockSpec(w.shape, lambda i: (0, 0)))      # resident weight
            if b is not None:
                in_specs.append(pl.BlockSpec(b.shape, lambda i: (0, 0)))  # resident bias

        cost = pl.CostEstimate(
            flops=2 * padded_m * matmul_macs,
            transcendentals=0,
            bytes_accessed=weight_bytes + padded_m * (in_dim * 2 + n_out_padded * 4),
        )

        full = pl.pallas_call(
            kernel,
            out_shape=jax.ShapeDtypeStruct((padded_m, n_out_padded), jnp.float32),
            grid=(padded_m // tm,),
            in_specs=in_specs,
            out_specs=pl.BlockSpec((tm, n_out_padded), lambda i: (i, 0)),
            compiler_params=pltpu.CompilerParams(
                dimension_semantics=("parallel",)),     # v7x: shard batch over both TCs
            cost_estimate=cost,
        )(a0, *flat_params)
        return full[:m, :out_size]                      # drop padded rows / zero lanes

    return jax.jit(forward)


# ----------------------------------------------------------------------------
# ConvNN wrapper (parameters initialized deterministically in-script)
# ----------------------------------------------------------------------------
class ConvNNPallas:
    def __init__(self, params, key):
        self.params = params
        channels_lst = params['channels_lst']
        assert 2 <= len(channels_lst) <= 5
        assert 'max_pool' not in params['extras_blocks_components']
        # TODO(synk): dropout / max_pool / batch_norm blocks and non-ReLU activations
        # are not exercised by this config (extras_blocks_components == []).

        keys = jax.random.split(key, 16)
        ki = 0
        in_wh = params['in_wh']

        # ---- raw f32 parameters (same init scheme / shapes as the PyTorch module) ----
        self.conv_ws = []
        for i in range(1, len(channels_lst)):
            cin, cout = channels_lst[i - 1], channels_lst[i]
            fan_in = cin * 4 * 4
            w = jax.random.normal(keys[ki], (cout, cin, 4, 4), jnp.float32) / jnp.sqrt(fan_in)
            ki += 1
            self.conv_ws.append(w)

        out_channels = channels_lst[-1]
        self.conv1x1 = None
        if params['CNN_out_channels'] is not None:
            cout = params['CNN_out_channels']
            w = jax.random.normal(keys[ki], (cout, out_channels, 1, 1), jnp.float32) / jnp.sqrt(out_channels)
            ki += 1
            b = 0.01 * jax.random.normal(keys[ki], (cout,), jnp.float32)
            ki += 1
            self.conv1x1 = (w, b)
            out_channels = cout

        wh = in_wh // 2 ** (len(channels_lst) - 1)
        lin_w = out_channels * wh ** 2
        self.lin = []
        for _ in range(params['#FC_Layers'] - 1):
            w = jax.random.normal(keys[ki], (lin_w, lin_w), jnp.float32) / jnp.sqrt(lin_w)
            ki += 1
            b = 0.01 * jax.random.normal(keys[ki], (lin_w,), jnp.float32)
            ki += 1
            self.lin.append((w, b))
        w = jax.random.normal(keys[ki], (params['out_size'], lin_w), jnp.float32) / jnp.sqrt(lin_w)
        ki += 1
        b = 0.01 * jax.random.normal(keys[ki], (params['out_size'],), jnp.float32)
        self.lin.append((w, b))

        # ---- fold the whole network into one fused-kernel layer list (init-time only) ----
        layers = []
        H = in_wh
        for cw in self.conv_ws:                                   # stride-2 convs, no bias, ReLU
            M, Ho, _ = _conv_as_dense_matrix(cw, H, H, stride=2, padding=1)
            layers.append((M, None, True))
            H = Ho
        if self.conv1x1 is not None:                              # 1x1 conv, bias, ReLU
            cw, cb = self.conv1x1
            M, Ho, Wo = _conv_as_dense_matrix(cw, H, H, stride=1, padding=0)
            bias = jnp.repeat(cb, Ho * Wo).reshape(1, -1)         # NCHW flatten: c-major bias
            layers.append((M, bias, True))

        # All FC layers (no activation between them) fold into ONE matmul + bias,
        # zero-padded to a lane-dense 128-wide output.
        out_size = params['out_size']
        n_pad = max(128, ((out_size + 127) // 128) * 128)
        fw_last, fb_last = self.lin[-1]
        W = jnp.zeros((fw_last.shape[1], n_pad), jnp.float32).at[:, :out_size].set(fw_last.T)
        b = jnp.zeros((1, n_pad), jnp.float32).at[0, :out_size].set(fb_last)
        for fw, fb in reversed(self.lin[:-1]):
            # y = x @ fw.T + fb ; z = y @ W + b  =>  z = x @ (fw.T @ W) + (fb @ W + b)
            b = jnp.dot(fb.reshape(1, -1), W, precision=jax.lax.Precision.HIGHEST) + b
            W = jnp.dot(fw.T, W, precision=jax.lax.Precision.HIGHEST)
        layers.append((W, b, False))

        # ---- dtype packing: bf16 weights (MXU-native, halves HBM stream), f32 biases ----
        layers = [(w.astype(jnp.bfloat16),
                   None if bias is None else bias.astype(jnp.float32),
                   relu)
                  for w, bias, relu in layers]

        self._forward = _build_fused_forward(layers, out_size)

    def __call__(self, x):
        if x.ndim == 3:
            x = x[None, ...]
        assert x.shape[2] == x.shape[3] == self.params['in_wh']
        assert x.shape[1] == self.params['channels_lst'][0]
        return self._forward(x)


# ----------------------------------------------------------------------------
# Plain-JAX per-layer reference (high precision, f32) used only for self-checking.
# ----------------------------------------------------------------------------
def _reference_forward(model, x):
    hp = jax.lax.Precision.HIGHEST
    h = x
    for w in model.conv_ws:
        patches, Ho, Wo = _im2col(h, 4, 2, 1)
        y = jnp.maximum(jnp.dot(patches, w.reshape(w.shape[0], -1).T, precision=hp), 0.0)
        h = y.reshape(h.shape[0], Ho, Wo, w.shape[0]).transpose(0, 3, 1, 2)
    if model.conv1x1 is not None:
        w, b = model.conv1x1
        patches, Ho, Wo = _im2col(h, 1, 1, 0)
        y = jnp.maximum(jnp.dot(patches, w.reshape(w.shape[0], -1).T, precision=hp) + b, 0.0)
        h = y.reshape(h.shape[0], Ho, Wo, w.shape[0]).transpose(0, 3, 1, 2)
    flat = h.reshape(x.shape[0], -1)
    for w, b in model.lin:
        flat = jnp.dot(flat, w.T, precision=hp) + b
    return flat


if __name__ == "__main__":
    params = {
        'channels_lst': [4, 8, 16],
        'extras_blocks_components': [],
        'activation': 'relu',
        'p_dropout': 0.0,
        'CNN_out_channels': 8,
        '#FC_Layers': 2,
        'in_wh': 16,
        'out_size': 10,
    }

    key = jax.random.PRNGKey(0)
    k_model, k_x, k_x2 = jax.random.split(key, 3)
    model = ConvNNPallas(params, k_model)

    # ---- small batch (single grid tile, padded 2 -> 16 rows) ----
    x = jax.random.normal(k_x, (2, 4, 16, 16), jnp.float32)   # NCHW
    out = jax.block_until_ready(model(x))
    assert out.shape == (2, 10), out.shape
    assert bool(jnp.all(jnp.isfinite(out)))

    ref = jax.block_until_ready(_reference_forward(model, x))
    max_err = float(jnp.max(jnp.abs(out - ref)))
    assert jnp.allclose(out, ref, rtol=5e-2, atol=5e-2), max_err

    # ---- larger batch (exercises the batch grid: 300 -> 512 rows, 2 tiles of 256) ----
    x2 = jax.random.normal(k_x2, (300, 4, 16, 16), jnp.float32)
    out2 = jax.block_until_ready(model(x2))
    assert out2.shape == (300, 10), out2.shape
    assert bool(jnp.all(jnp.isfinite(out2)))
    ref2 = jax.block_until_ready(_reference_forward(model, x2))
    rel_l2 = float(jnp.linalg.norm(out2 - ref2) / (jnp.linalg.norm(ref2) + 1e-12))
    assert rel_l2 < 3e-2, rel_l2   # bf16-weight kernel vs f32 HIGHEST reference

    print("KERNEL_OK")
</pallas_src>

<mosaic_0001>
module attributes {stable_mosaic.version = 11 : i64} {
  func.func @kernel(%arg0: i32, %arg1: memref<16x1024xbf16, #tpu.memory_space<vmem>>, %arg2: memref<1024x512xbf16, #tpu.memory_space<vmem>>, %arg3: memref<512x256xbf16, #tpu.memory_space<vmem>>, %arg4: memref<256x128xbf16, #tpu.memory_space<vmem>>, %arg5: memref<1x128xf32, #tpu.memory_space<vmem>>, %arg6: memref<128x128xbf16, #tpu.memory_space<vmem>>, %arg7: memref<1x128xf32, #tpu.memory_space<vmem>>, %arg8: memref<16x128xf32, #tpu.memory_space<vmem>>) attributes {dimension_semantics = [#tpu.dimension_semantics<parallel>], iteration_bounds = array<i64: 1>, scalar_prefetch = 0 : i64, scratch_operands = 0 : i64, tpu.core_type = #tpu.core_type<tc>, window_params = [{transform_indices = @transform_0, window_bounds = array<i64: 16, 1024>}, {pipeline_mode = #tpu.pipeline_mode<synchronous>, transform_indices = @transform_1, window_bounds = array<i64: 1024, 512>}, {pipeline_mode = #tpu.pipeline_mode<synchronous>, transform_indices = @transform_2, window_bounds = array<i64: 512, 256>}, {pipeline_mode = #tpu.pipeline_mode<synchronous>, transform_indices = @transform_3, window_bounds = array<i64: 256, 128>}, {pipeline_mode = #tpu.pipeline_mode<synchronous>, transform_indices = @transform_4, window_bounds = array<i64: 1, 128>}, {pipeline_mode = #tpu.pipeline_mode<synchronous>, transform_indices = @transform_5, window_bounds = array<i64: 128, 128>}, {pipeline_mode = #tpu.pipeline_mode<synchronous>, transform_indices = @transform_6, window_bounds = array<i64: 1, 128>}, {transform_indices = @transform_7, window_bounds = array<i64: 16, 128>}]} {
    %c0 = arith.constant 0 : index
    %c0_0 = arith.constant 0 : index
    %0 = vector.load %arg1[%c0, %c0_0] : memref<16x1024xbf16, #tpu.memory_space<vmem>>, vector<16x1024xbf16>
    %c0_1 = arith.constant 0 : index
    %c0_2 = arith.constant 0 : index
    %1 = vector.load %arg2[%c0_1, %c0_2] : memref<1024x512xbf16, #tpu.memory_space<vmem>>, vector<1024x512xbf16>
    %cst = arith.constant dense<0.000000e+00> : vector<16x512xf32>
    %2 = tpu.matmul %0, %1, %cst {dimension_numbers = #tpu.dot_dimension_numbers<[1], [0], [0], [1], [0, 0, 1, 1], [], []>} : vector<16x1024xbf16>, vector<1024x512xbf16>, vector<16x512xf32> -> vector<16x512xf32>
    %cst_3 = arith.constant 0.000000e+00 : f32
    %3 = vector.broadcast %cst_3 : f32 to vector<16x512xf32>
    %4 = arith.maximumf %2, %3 : vector<16x512xf32>
    %5 = arith.truncf %4 : vector<16x512xf32> to vector<16x512xbf16>
    %c0_4 = arith.constant 0 : index
    %c0_5 = arith.constant 0 : index
    %6 = vector.load %arg3[%c0_4, %c0_5] : memref<512x256xbf16, #tpu.memory_space<vmem>>, vector<512x256xbf16>
    %cst_6 = arith.constant dense<0.000000e+00> : vector<16x256xf32>
    %7 = tpu.matmul %5, %6, %cst_6 {dimension_numbers = #tpu.dot_dimension_numbers<[1], [0], [0], [1], [0, 0, 1, 1], [], []>} : vector<16x512xbf16>, vector<512x256xbf16>, vector<16x256xf32> -> vector<16x256xf32>
    %cst_7 = arith.constant 0.000000e+00 : f32
    %8 = vector.broadcast %cst_7 : f32 to vector<16x256xf32>
    %9 = arith.maximumf %7, %8 : vector<16x256xf32>
    %10 = arith.truncf %9 : vector<16x256xf32> to vector<16x256xbf16>
    %c0_8 = arith.constant 0 : index
    %c0_9 = arith.constant 0 : index
    %11 = vector.load %arg4[%c0_8, %c0_9] : memref<256x128xbf16, #tpu.memory_space<vmem>>, vector<256x128xbf16>
    %cst_10 = arith.constant dense<0.000000e+00> : vector<16x128xf32>
    %12 = tpu.matmul %10, %11, %cst_10 {dimension_numbers = #tpu.dot_dimension_numbers<[1], [0], [0], [1], [0, 0, 1, 1], [], []>} : vector<16x256xbf16>, vector<256x128xbf16>, vector<16x128xf32> -> vector<16x128xf32>
    %c0_11 = arith.constant 0 : index
    %c0_12 = arith.constant 0 : index
    %13 = vector.load %arg5[%c0_11, %c0_12] : memref<1x128xf32, #tpu.memory_space<vmem>>, vector<1x128xf32>
    %14 = vector.broadcast %13 : vector<1x128xf32> to vector<16x128xf32>
    %15 = arith.addf %12, %14 : vector<16x128xf32>
    %cst_13 = arith.constant 0.000000e+00 : f32
    %16 = vector.broadcast %cst_13 : f32 to vector<16x128xf32>
    %17 = arith.maximumf %15, %16 : vector<16x128xf32>
    %18 = arith.truncf %17 : vector<16x128xf32> to vector<16x128xbf16>
    %c0_14 = arith.constant 0 : index
    %c0_15 = arith.constant 0 : index
    %19 = vector.load %arg6[%c0_14, %c0_15] : memref<128x128xbf16, #tpu.memory_space<vmem>>, vector<128x128xbf16>
    %cst_16 = arith.constant dense<0.000000e+00> : vector<16x128xf32>
    %20 = tpu.matmul %18, %19, %cst_16 {dimension_numbers = #tpu.dot_dimension_numbers<[1], [0], [0], [1], [0, 0, 1, 1], [], []>} : vector<16x128xbf16>, vector<128x128xbf16>, vector<16x128xf32> -> vector<16x128xf32>
    %c0_17 = arith.constant 0 : index
    %c0_18 = arith.constant 0 : index
    %21 = vector.load %arg7[%c0_17, %c0_18] : memref<1x128xf32, #tpu.memory_space<vmem>>, vector<1x128xf32>
    %22 = vector.broadcast %21 : vector<1x128xf32> to vector<16x128xf32>
    %23 = arith.addf %20, %22 : vector<16x128xf32>
    %c0_19 = arith.constant 0 : index
    %c0_20 = arith.constant 0 : index
    %24 = vector.load %arg8[%c0_19, %c0_20] : memref<16x128xf32, #tpu.memory_space<vmem>>, vector<16x128xf32>
    tpu.vector_store %arg8[%c0_19, %c0_20], %23 {strides = array<i32>} : memref<16x128xf32, #tpu.memory_space<vmem>>, vector<16x128xf32>,
    return
  }
  func.func @transform_0(%arg0: i32) -> (i32, i32) {
    %c0_i32 = arith.constant 0 : i32
    %c0_i32_0 = arith.constant 0 : i32
    return %arg0, %c0_i32 : i32, i32
  }
  func.func @transform_1(%arg0: i32) -> (i32, i32) {
    %c0_i32 = arith.constant 0 : i32
    %c0_i32_0 = arith.constant 0 : i32
    %c0_i32_1 = arith.constant 0 : i32
    return %c0_i32, %c0_i32_0 : i32, i32
  }
  func.func @transform_2(%arg0: i32) -> (i32, i32) {
    %c0_i32 = arith.constant 0 : i32
    %c0_i32_0 = arith.constant 0 : i32
    %c0_i32_1 = arith.constant 0 : i32
    return %c0_i32, %c0_i32_0 : i32, i32
  }
  func.func @transform_3(%arg0: i32) -> (i32, i32) {
    %c0_i32 = arith.constant 0 : i32
    %c0_i32_0 = arith.constant 0 : i32
    %c0_i32_1 = arith.constant 0 : i32
    return %c0_i32, %c0_i32_0 : i32, i32
  }
  func.func @transform_4(%arg0: i32) -> (i32, i32) {
    %c0_i32 = arith.constant 0 : i32
    %c0_i32_0 = arith.constant 0 : i32
    %c0_i32_1 = arith.constant 0 : i32
    return %c0_i32, %c0_i32_0 : i32, i32
  }
  func.func @transform_5(%arg0: i32) -> (i32, i32) {
    %c0_i32 = arith.constant 0 : i32
    %c0_i32_0 = arith.constant 0 : i32
    %c0_i32_1 = arith.constant 0 : i32
    return %c0_i32, %c0_i32_0 : i32, i32
  }
  func.func @transform_6(%arg0: i32) -> (i32, i32) {
    %c0_i32 = arith.constant 0 : i32
    %c0_i32_0 = arith.constant 0 : i32
    %c0_i32_1 = arith.constant 0 : i32
    return %c0_i32, %c0_i32_0 : i32, i32
  }
  func.func @transform_7(%arg0: i32) -> (i32, i32) {
    %c0_i32 = arith.constant 0 : i32
    %c0_i32_0 = arith.constant 0 : i32
    return %arg0, %c0_i32 : i32, i32
  }
}

</mosaic_0001>

<bundles_post_ra>
// kernel: forward.1
= control target key start
LH: loop header
LB: loop body
LE: loop exit
PB: predicated region body
PF: predicated region fallthrough
CT: control target
= control target key end

     0   :  { %vm3680_vm0 = vmmov 0   ;;  %s4816_s1 = inlined_call_operand.vmem [shape: bf16[1024,512], index: 1, kind: input, shape index: {}]   ;;  %s4817_s0 = inlined_call_operand.vmem [shape: bf16[16,1024], index: 0, kind: input, shape index: {}]   ;;  %s4818_s2 = inlined_call_operand.vmem [shape: bf16[512,256], index: 2, kind: input, shape index: {}]   ;;  %s4819_s3 = inlined_call_operand.vmem [shape: bf16[256,128], index: 3, kind: input, shape index: {}]   ;;  %s4820_s5 = inlined_call_operand.vmem [shape: bf16[128,128], index: 5, kind: input, shape index: {}]   ;;  %s4821_s4 = inlined_call_operand.vmem [shape: f32[1,128], index: 4, kind: input, shape index: {}]   ;;  %s4822_s6 = inlined_call_operand.vmem [shape: f32[1,128], index: 6, kind: input, shape index: {}]   ;;  %s4823_s7 = inlined_call_operand.vmem [shape: f32[16,128], index: 7, kind: output, shape index: {}]  }
   0x1   :  { %v3175_v0 = vld [vmem:[%s4816_s1 + $0x4] ss:$16 sps:$4 sm:$0xff]   ;;  %v3177_v1 = vld [vmem:[%s4816_s1 + $0xc] ss:$16 sps:$4 sm:$0xff]   ;;  %v3179_v2 = vld [vmem:[%s4816_s1] ss:$16 sps:$4 sm:$0xff]  }
   0x2   :  { %1611 = vmatprep.subr.bf16.mxu0 %v3175_v0  ;;  %v3180_v3 = vld [vmem:[%s4816_s1 + $0x8] ss:$16 sps:$4 sm:$0xff]   ;;  %1783 = vmatprep.subr.bf16.mxu1 %v3177_v1  ;;  %v3181_v4 = vld [vmem:[%s4816_s1 + $0x24] ss:$16 sps:$4 sm:$0xff]   ;;  %v3183_v5 = vld [vmem:[%s4816_s1 + $0x2c] ss:$16 sps:$4 sm:$0xff]  }
   0x3   :  { %1612 = vmatpush1.bf16.msra.mxu0 %v3179_v2  ;;  %1784 = vmatpush1.bf16.msra.mxu1 %v3180_v3  ;;  %v3185_v6 = vld [vmem:[%s4816_s1 + $0x20] ss:$16 sps:$4 sm:$0xff]   ;;  %v3186_v7 = vld [vmem:[%s4816_s1 + $0x28] ss:$16 sps:$4 sm:$0xff]   ;;  %v3187_v8 = vld [vmem:[%s4816_s1 + $0x44] ss:$16 sps:$4 sm:$0xff]  }
   0x4   :  { %1613 = vmatprep.subr.bf16.mxu0 %v3181_v4  ;;  %1785 = vmatprep.subr.bf16.mxu1 %v3183_v5  ;;  %v3189_v9 = vld [vmem:[%s4816_s1 + $0x4c] ss:$16 sps:$4 sm:$0xff]   ;;  %v3191_v10 = vld [vmem:[%s4816_s1 + $0x40] ss:$16 sps:$4 sm:$0xff]   ;;  %v3192_v11 = vld [vmem:[%s4816_s1 + $0x48] ss:$16 sps:$4 sm:$0xff]  }
   0x5   :  { %v3193_v12 = vld [vmem:[%s4816_s1 + $0x64] ss:$16 sps:$4 sm:$0xff]   ;;  %v3195_v13 = vld [vmem:[%s4816_s1 + $0x6c] ss:$16 sps:$4 sm:$0xff]   ;;  %v3197_v14 = vld [vmem:[%s4816_s1 + $0x60] ss:$16 sps:$4 sm:$0xff]  }
   0x6   :  { %v3198_v15 = vld [vmem:[%s4816_s1 + $0x68] ss:$16 sps:$4 sm:$0xff]   ;;  %v3199_v16 = vld [vmem:[%s4816_s1 + $0x84] ss:$16 sps:$4 sm:$0xff]   ;;  %v3201_v17 = vld [vmem:[%s4816_s1 + $0x8c] ss:$16 sps:$4 sm:$0xff]  }
   0x7   :  { %1614 = vmatpush1.bf16.msra.mxu0 %v3185_v6  ;;  %1786 = vmatpush1.bf16.msra.mxu1 %v3186_v7  ;;  %v3203_v18 = vld [vmem:[%s4816_s1 + $0x80] ss:$16 sps:$4 sm:$0xff]   ;;  %v3204_v19 = vld [vmem:[%s4816_s1 + $0x88] ss:$16 sps:$4 sm:$0xff]   ;;  %v3205_v20 = vld [vmem:[%s4816_s1 + $0xa4] ss:$16 sps:$4 sm:$0xff]  }
   0x8   :  { %1615 = vmatprep.subr.bf16.mxu0 %v3187_v8  ;;  %1787 = vmatprep.subr.bf16.mxu1 %v3189_v9  ;;  %v3207_v21 = vld [vmem:[%s4816_s1 + $0xac] ss:$16 sps:$4 sm:$0xff]   ;;  %v3209_v22 = vld [vmem:[%s4816_s1 + $0xa0] ss:$16 sps:$4 sm:$0xff]   ;;  %v3210_v23 = vld [vmem:[%s4816_s1 + $0xa8] ss:$16 sps:$4 sm:$0xff]  }
   0x9   :  { %v3211_v24 = vld [vmem:[%s4816_s1 + $0xc4] ss:$16 sps:$4 sm:$0xff]   ;;  %v3213_v25 = vld [vmem:[%s4816_s1 + $0xcc] ss:$16 sps:$4 sm:$0xff]   ;;  %v3215_v26 = vld [vmem:[%s4816_s1 + $0xc0] ss:$16 sps:$4 sm:$0xff]  }
   0xa   :  { %v3216_v27 = vld [vmem:[%s4816_s1 + $0xc8] ss:$16 sps:$4 sm:$0xff]   ;;  %v3217_v28 = vld [vmem:[%s4816_s1 + $0xe4] ss:$16 sps:$4 sm:$0xff]   ;;  %v3219_v29 = vld [vmem:[%s4816_s1 + $0xec] ss:$16 sps:$4 sm:$0xff]  }
   0xb   :  { %1616 = vmatpush1.bf16.msra.mxu0 %v3191_v10  ;;  %1788 = vmatpush1.bf16.msra.mxu1 %v3192_v11  ;;  %v3221_v30 = vld [vmem:[%s4816_s1 + $0xe0] ss:$16 sps:$4 sm:$0xff]   ;;  %v3222_v31 = vld [vmem:[%s4816_s1 + $0xe8] ss:$16 sps:$4 sm:$0xff]   ;;  %v3223_v32 = vld [vmem:[%s4816_s1 + $0x104] ss:$16 sps:$4 sm:$0xff]  }
   0xc   :  { %1617 = vmatprep.subr.bf16.mxu0 %v3193_v12  ;;  %1789 = vmatprep.subr.bf16.mxu1 %v3195_v13  ;;  %v3225_v33 = vld [vmem:[%s4816_s1 + $0x10c] ss:$16 sps:$4 sm:$0xff]   ;;  %v3227_v34 = vld [vmem:[%s4816_s1 + $0x100] ss:$16 sps:$4 sm:$0xff]   ;;  %v3228_v35 = vld [vmem:[%s4816_s1 + $0x108] ss:$16 sps:$4 sm:$0xff]  }
   0xd   :  { %v3229_v36 = vld [vmem:[%s4816_s1 + $0x124] ss:$16 sps:$4 sm:$0xff]   ;;  %v3231_v37 = vld [vmem:[%s4816_s1 + $0x12c] ss:$16 sps:$4 sm:$0xff]   ;;  %v3233_v38 = vld [vmem:[%s4816_s1 + $0x120] ss:$16 sps:$4 sm:$0xff]  }
   0xe   :  { %v3234_v39 = vld [vmem:[%s4816_s1 + $0x128] ss:$16 sps:$4 sm:$0xff]   ;;  %v3235_v40 = vld [vmem:[%s4816_s1 + $0x144] ss:$16 sps:$4 sm:$0xff]   ;;  %v3237_v41 = vld [vmem:[%s4816_s1 + $0x14c] ss:$16 sps:$4 sm:$0xff]  }
   0xf   :  { %1618 = vmatpush1.bf16.msra.mxu0 %v3197_v14  ;;  %1790 = vmatpush1.bf16.msra.mxu1 %v3198_v15  ;;  %v3239_v42 = vld [vmem:[%s4816_s1 + $0x140] ss:$16 sps:$4 sm:$0xff]   ;;  %v3240_v43 = vld [vmem:[%s4816_s1 + $0x148] ss:$16 sps:$4 sm:$0xff]   ;;  %v3241_v44 = vld [vmem:[%s4816_s1 + $0x164] ss:$16 sps:$4 sm:$0xff]  }
  0x10   :  { %1619 = vmatprep.subr.bf16.mxu0 %v3199_v16  ;;  %1791 = vmatprep.subr.bf16.mxu1 %v3201_v17  ;;  %v3243_v45 = vld [vmem:[%s4816_s1 + $0x16c] ss:$16 sps:$4 sm:$0xff]   ;;  %v27_v46 = vld [vmem:[%s4817_s0] sm:$0xff]  ;;  %v3246_v49 = vld [vmem:[%s4816_s1 + $0x168] ss:$16 sps:$4 sm:$0xff]  }
  0x11   :  { %v31_v47 = vld [vmem:[%s4817_s0 + $0x20] sm:$0xff]  ;;  %v3249_v52 = vld [vmem:[%s4816_s1 + $0x18c] ss:$16 sps:$4 sm:$0xff]   ;;  %v3252_v54 = vld [vmem:[%s4816_s1 + $0x188] ss:$16 sps:$4 sm:$0xff]  }
  0x12   :  { %v3245_v48 = vld [vmem:[%s4816_s1 + $0x160] ss:$16 sps:$4 sm:$0xff]   ;;  %v2741_v50 = vcombine.high %v27_v46, %v31_v47  ;;  %v3247_v51 = vld [vmem:[%s4816_s1 + $0x184] ss:$16 sps:$4 sm:$0xff]   ;;  %v3255_v56 = vld [vmem:[%s4816_s1 + $0x1ac] ss:$16 sps:$4 sm:$0xff]   ;;  %v2740_v5 = vcombine.low %v27_v46, %v31_v47 }
  0x13   :  { %1620 = vmatpush1.bf16.msra.mxu0 %v3203_v18  ;;  %1792 = vmatpush1.bf16.msra.mxu1 %v3204_v19  ;;  %v3251_v53 = vld [vmem:[%s4816_s1 + $0x180] ss:$16 sps:$4 sm:$0xff]   ;;  %v3253_v55 = vld [vmem:[%s4816_s1 + $0x1a4] ss:$16 sps:$4 sm:$0xff]   ;;  %v3258_v58 = vld [vmem:[%s4816_s1 + $0x1a8] ss:$16 sps:$4 sm:$0xff]  }
  0x14   :  { %1621 = vmatprep.subr.bf16.mxu0 %v3205_v20  ;;  %1793 = vmatprep.subr.bf16.mxu1 %v3207_v21  ;;  %v3257_v57 = vld [vmem:[%s4816_s1 + $0x1a0] ss:$16 sps:$4 sm:$0xff]   ;;  %v3259_v59 = vld [vmem:[%s4816_s1 + $0x1c4] ss:$16 sps:$4 sm:$0xff]   ;;  %v3261_v60 = vld [vmem:[%s4816_s1 + $0x1cc] ss:$16 sps:$4 sm:$0xff]  }
  0x15   :  { %1643 = vmatprep.mubr.bf16.mxu0 %v2741_v50  ;;  %1815 = vmatprep.mubr.bf16.mxu1 %v2741_v50  ;;  %v3263_v61 = vld [vmem:[%s4816_s1 + $0x1c0] ss:$16 sps:$4 sm:$0xff]   ;;  %v3264_v62 = vld [vmem:[%s4816_s1 + $0x1c8] ss:$16 sps:$4 sm:$0xff]   ;;  %v3265_v63 = vld [vmem:[%s4816_s1 + $0x1e4] ss:$16 sps:$4 sm:$0xff]  }
  0x16   :  { %v3267_v0 = vld [vmem:[%s4816_s1 + $0x1ec] ss:$16 sps:$4 sm:$0xff]   ;;  %v3269_v1 = vld [vmem:[%s4816_s1 + $0x1e0] ss:$16 sps:$4 sm:$0xff]   ;;  %v3270_v2 = vld [vmem:[%s4816_s1 + $0x1e8] ss:$16 sps:$4 sm:$0xff]  }
  0x17   :  { %1622 = vmatpush1.bf16.msra.mxu0 %v3209_v22  ;;  %1794 = vmatpush1.bf16.msra.mxu1 %v3210_v23  ;;  %v3273_v3 = vld [vmem:[%s4816_s1 + $0x204] ss:$16 sps:$4 sm:$0xff]   ;;  %v3276_v4 = vld [vmem:[%s4816_s1 + $0x20c] ss:$16 sps:$4 sm:$0xff]   ;;  %v3271_v6 = vld [vmem:[%s4816_s1 + $0x200] ss:$16 sps:$4 sm:$0xff]  }
  0x18   :  { %1623 = vmatprep.subr.bf16.mxu0 %v3211_v24  ;;  %1795 = vmatprep.subr.bf16.mxu1 %v3213_v25  ;;  %v3274_v7 = vld [vmem:[%s4816_s1 + $0x208] ss:$16 sps:$4 sm:$0xff]   ;;  %v3279_v8 = vld [vmem:[%s4816_s1 + $0x224] ss:$16 sps:$4 sm:$0xff]   ;;  %v3282_v9 = vld [vmem:[%s4816_s1 + $0x22c] ss:$16 sps:$4 sm:$0xff]  }
  0x19   :  { %v3277_v10 = vld [vmem:[%s4816_s1 + $0x220] ss:$16 sps:$4 sm:$0xff]   ;;  %v3280_v11 = vld [vmem:[%s4816_s1 + $0x228] ss:$16 sps:$4 sm:$0xff]   ;;  %v3285_v12 = vld [vmem:[%s4816_s1 + $0x244] ss:$16 sps:$4 sm:$0xff]  }
  0x1a   :  { %v3288_v13 = vld [vmem:[%s4816_s1 + $0x24c] ss:$16 sps:$4 sm:$0xff]   ;;  %v3283_v14 = vld [vmem:[%s4816_s1 + $0x240] ss:$16 sps:$4 sm:$0xff]   ;;  %v3286_v15 = vld [vmem:[%s4816_s1 + $0x248] ss:$16 sps:$4 sm:$0xff]  }
  0x1b   :  { %1624 = vmatpush1.bf16.msra.mxu0 %v3215_v26  ;;  %1796 = vmatpush1.bf16.msra.mxu1 %v3216_v27  ;;  %v3291_v16 = vld [vmem:[%s4816_s1 + $0x264] ss:$16 sps:$4 sm:$0xff]   ;;  %v3294_v17 = vld [vmem:[%s4816_s1 + $0x26c] ss:$16 sps:$4 sm:$0xff]   ;;  %v3289_v18 = vld [vmem:[%s4816_s1 + $0x260] ss:$16 sps:$4 sm:$0xff]  }
  0x1c   :  { %1625 = vmatprep.subr.bf16.mxu0 %v3217_v28  ;;  %1797 = vmatprep.subr.bf16.mxu1 %v3219_v29  ;;  %v3292_v19 = vld [vmem:[%s4816_s1 + $0x268] ss:$16 sps:$4 sm:$0xff]   ;;  %v3297_v20 = vld [vmem:[%s4816_s1 + $0x284] ss:$16 sps:$4 sm:$0xff]   ;;  %v3300_v21 = vld [vmem:[%s4816_s1 + $0x28c] ss:$16 sps:$4 sm:$0xff]  }
  0x1d   :  { %v3295_v22 = vld [vmem:[%s4816_s1 + $0x280] ss:$16 sps:$4 sm:$0xff]   ;;  %v3298_v23 = vld [vmem:[%s4816_s1 + $0x288] ss:$16 sps:$4 sm:$0xff]   ;;  %v3303_v24 = vld [vmem:[%s4816_s1 + $0x2a4] ss:$16 sps:$4 sm:$0xff]  }
  0x1e   :  { %v3306_v25 = vld [vmem:[%s4816_s1 + $0x2ac] ss:$16 sps:$4 sm:$0xff]   ;;  %v3301_v26 = vld [vmem:[%s4816_s1 + $0x2a0] ss:$16 sps:$4 sm:$0xff]   ;;  %v3304_v27 = vld [vmem:[%s4816_s1 + $0x2a8] ss:$16 sps:$4 sm:$0xff]  }
  0x1f   :  { %1626 = vmatpush1.bf16.msra.mxu0 %v3221_v30  ;;  %1798 = vmatpush1.bf16.msra.mxu1 %v3222_v31  ;;  %v3309_v28 = vld [vmem:[%s4816_s1 + $0x2c4] ss:$16 sps:$4 sm:$0xff]   ;;  %v3312_v29 = vld [vmem:[%s4816_s1 + $0x2cc] ss:$16 sps:$4 sm:$0xff]   ;;  %v3328_v46 = vld [vmem:[%s4816_s1 + $0x328] ss:$16 sps:$4 sm:$0xff]  }
  0x20   :  { %1627 = vmatprep.subr.bf16.mxu0 %v3223_v32  ;;  %1799 = vmatprep.subr.bf16.mxu1 %v3225_v33  ;;  %v4000_v30 = vld [vmem:[%s4817_s0 + $0x8] sm:$0xff]  ;;  %v3307_v32 = vld [vmem:[%s4816_s1 + $0x2c0] ss:$16 sps:$4 sm:$0xff]   ;;  %v3333_v47 = vld [vmem:[%s4816_s1 + $0x344] ss:$16 sps:$4 sm:$0xff]  }
  0x21   :  { %v4005_v31 = vld [vmem:[%s4817_s0 + $0x28] sm:$0xff] }
  0x22   :  { %v3310_v33 = vld [vmem:[%s4816_s1 + $0x2c8] ss:$16 sps:$4 sm:$0xff]  }
  0x23   :  { %1628 = vmatpush1.bf16.msra.mxu0 %v3227_v34  ;;  %1800 = vmatpush1.bf16.msra.mxu1 %v3228_v35  ;;  %v2743_v34 = vcombine.high %v4000_v30, %v4005_v31  ;;  %v3315_v35 = vld [vmem:[%s4816_s1 + $0x2e4] ss:$16 sps:$4 sm:$0xff]   ;;  %v3334_v50 = vld [vmem:[%s4816_s1 + $0x348] ss:$16 sps:$4 sm:$0xff]  }
  0x24   :  { %1629 = vmatprep.subr.bf16.mxu0 %v3229_v36  ;;  %1801 = vmatprep.subr.bf16.mxu1 %v3231_v37  ;;  %v3318_v36 = vld [vmem:[%s4816_s1 + $0x2ec] ss:$16 sps:$4 sm:$0xff]   ;;  %v3313_v37 = vld [vmem:[%s4816_s1 + $0x2e0] ss:$16 sps:$4 sm:$0xff]  }
  0x27   :  { %1630 = vmatpush1.bf16.msra.mxu0 %v3233_v38  ;;  %1802 = vmatpush1.bf16.msra.mxu1 %v3234_v39  ;;  %v3316_v38 = vld [vmem:[%s4816_s1 + $0x2e8] ss:$16 sps:$4 sm:$0xff]   ;;  %v3321_v39 = vld [vmem:[%s4816_s1 + $0x304] ss:$16 sps:$4 sm:$0xff]  }
  0x28   :  { %1631 = vmatprep.subr.bf16.mxu0 %v3235_v40  ;;  %1803 = vmatprep.subr.bf16.mxu1 %v3237_v41  ;;  %v3324_v40 = vld [vmem:[%s4816_s1 + $0x30c] ss:$16 sps:$4 sm:$0xff]   ;;  %v3319_v41 = vld [vmem:[%s4816_s1 + $0x300] ss:$16 sps:$4 sm:$0xff]  }
  0x2b   :  { %1632 = vmatpush1.bf16.msra.mxu0 %v3239_v42  ;;  %1804 = vmatpush1.bf16.msra.mxu1 %v3240_v43  ;;  %v3322_v42 = vld [vmem:[%s4816_s1 + $0x308] ss:$16 sps:$4 sm:$0xff]   ;;  %v3327_v43 = vld [vmem:[%s4816_s1 + $0x324] ss:$16 sps:$4 sm:$0xff]  }
  0x2c   :  { %1633 = vmatprep.subr.bf16.mxu0 %v3241_v44  ;;  %1805 = vmatprep.subr.bf16.mxu1 %v3243_v45  ;;  %v3330_v44 = vld [vmem:[%s4816_s1 + $0x32c] ss:$16 sps:$4 sm:$0xff]   ;;  %v3325_v45 = vld [vmem:[%s4816_s1 + $0x320] ss:$16 sps:$4 sm:$0xff]  }
  0x2f   :  { %1634 = vmatpush1.bf16.msra.mxu0 %v3245_v48  ;;  %1806 = vmatpush1.bf16.msra.mxu1 %v3246_v49  ;;  %v3336_v48 = vld [vmem:[%s4816_s1 + $0x34c] ss:$16 sps:$4 sm:$0xff]   ;;  %v3331_v49 = vld [vmem:[%s4816_s1 + $0x340] ss:$16 sps:$4 sm:$0xff]  }
  0x30   :  { %1635 = vmatprep.subr.bf16.mxu0 %v3247_v51  ;;  %1807 = vmatprep.subr.bf16.mxu1 %v3249_v52  ;;  %v3339_v51 = vld [vmem:[%s4816_s1 + $0x364] ss:$16 sps:$4 sm:$0xff]   ;;  %v3342_v52 = vld [vmem:[%s4816_s1 + $0x36c] ss:$16 sps:$4 sm:$0xff]  }
  0x33   :  { %1636 = vmatpush1.bf16.msra.mxu0 %v3251_v53  ;;  %1808 = vmatpush1.bf16.msra.mxu1 %v3252_v54  ;;  %v3337_v53 = vld [vmem:[%s4816_s1 + $0x360] ss:$16 sps:$4 sm:$0xff]   ;;  %v3340_v54 = vld [vmem:[%s4816_s1 + $0x368] ss:$16 sps:$4 sm:$0xff]  }
  0x34   :  { %1637 = vmatprep.subr.bf16.mxu0 %v3253_v55  ;;  %1809 = vmatprep.subr.bf16.mxu1 %v3255_v56  ;;  %v3345_v55 = vld [vmem:[%s4816_s1 + $0x384] ss:$16 sps:$4 sm:$0xff]   ;;  %v3348_v56 = vld [vmem:[%s4816_s1 + $0x38c] ss:$16 sps:$4 sm:$0xff]  }
  0x37   :  { %1638 = vmatpush1.bf16.msra.mxu0 %v3257_v57  ;;  %1810 = vmatpush1.bf16.msra.mxu1 %v3258_v58  ;;  %v3343_v57 = vld [vmem:[%s4816_s1 + $0x380] ss:$16 sps:$4 sm:$0xff]   ;;  %v3346_v58 = vld [vmem:[%s4816_s1 + $0x388] ss:$16 sps:$4 sm:$0xff]  }
  0x38   :  { %1639 = vmatprep.subr.bf16.mxu0 %v3259_v59  ;;  %1811 = vmatprep.subr.bf16.mxu1 %v3261_v60  ;;  %v3351_v59 = vld [vmem:[%s4816_s1 + $0x3a4] ss:$16 sps:$4 sm:$0xff]   ;;  %v3354_v60 = vld [vmem:[%s4816_s1 + $0x3ac] ss:$16 sps:$4 sm:$0xff]  }
  0x3b   :  { %1640 = vmatpush1.bf16.msra.mxu0 %v3263_v61  ;;  %1812 = vmatpush1.bf16.msra.mxu1 %v3264_v62  ;;  %v3349_v61 = vld [vmem:[%s4816_s1 + $0x3a0] ss:$16 sps:$4 sm:$0xff]   ;;  %v3352_v62 = vld [vmem:[%s4816_s1 + $0x3a8] ss:$16 sps:$4 sm:$0xff]  }
  0x3c   :  { %1641 = vmatprep.subr.bf16.mxu0 %v3265_v63  ;;  %1813 = vmatprep.subr.bf16.mxu1 %v3267_v0  ;;  %v3357_v63 = vld [vmem:[%s4816_s1 + $0x3c4] ss:$16 sps:$4 sm:$0xff]   ;;  %v3360_v0 = vld [vmem:[%s4816_s1 + $0x3cc] ss:$16 sps:$4 sm:$0xff]  }
  0x3f   :  { %1642 = vmatpush1.bf16.msra.mxu0 %v3269_v1  ;;  %1814 = vmatpush1.bf16.msra.mxu1 %v3270_v2  ;;  %v3355_v1 = vld [vmem:[%s4816_s1 + $0x3c0] ss:$16 sps:$4 sm:$0xff]   ;;  %v3358_v2 = vld [vmem:[%s4816_s1 + $0x3c8] ss:$16 sps:$4 sm:$0xff]  }
  0x40   :  { %1654 = vmatprep.subr.bf16.mxu0 %v3273_v3  ;;  %1826 = vmatprep.subr.bf16.mxu1 %v3276_v4  ;;  %v3363_v3 = vld [vmem:[%s4816_s1 + $0x3e4] ss:$16 sps:$4 sm:$0xff]   ;;  %v3366_v4 = vld [vmem:[%s4816_s1 + $0x3ec] ss:$16 sps:$4 sm:$0xff]  }
  0x42   :  { %1644 = vmatmul.mubr.bf16.vlgmr.msra.gmra.mrb[0].mxu0 %v2740_v5  ;;  %1816 = vmatmul.mubr.bf16.vlgmr.msra.gmra.mrb[0].mxu1 %v2740_v5  ;;  %v3361_v5 = vld [vmem:[%s4816_s1 + $0x3e0] ss:$16 sps:$4 sm:$0xff]  }
  0x43   :  { %1655 = vmatpush1.bf16.msra.mxu0 %v3271_v6  ;;  %1827 = vmatpush1.bf16.msra.mxu1 %v3274_v7  ;;  %v3364_v6 = vld [vmem:[%s4816_s1 + $0x3e8] ss:$16 sps:$4 sm:$0xff]   ;;  %v3369_v7 = vld [vmem:[%s4816_s1 + $0x404] ss:$16 sps:$4 sm:$0xff]  }
  0x44   :  { %1656 = vmatprep.subr.bf16.mxu0 %v3279_v8  ;;  %1828 = vmatprep.subr.bf16.mxu1 %v3282_v9  ;;  %v3372_v8 = vld [vmem:[%s4816_s1 + $0x40c] ss:$16 sps:$4 sm:$0xff]   ;;  %v2742_v9 = vcombine.low %v4000_v30, %v4005_v31  ;;  %v3394_v30 = vld [vmem:[%s4816_s1 + $0x488] ss:$16 sps:$4 sm:$0xff]   ;;  %v3399_v31 = vld [vmem:[%s4816_s1 + $0x4a4] ss:$16 sps:$4 sm:$0xff]  }
  0x45   :  { %1686 = vmatprep.mubr.bf16.mxu0 %v2743_v34  ;;  %1858 = vmatprep.mubr.bf16.mxu1 %v2743_v34  ;;  %v3400_v34 = vld [vmem:[%s4816_s1 + $0x4a8] ss:$16 sps:$4 sm:$0xff]  }
  0x47   :  { %1657 = vmatpush1.bf16.msra.mxu0 %v3277_v10  ;;  %1829 = vmatpush1.bf16.msra.mxu1 %v3280_v11  ;;  %v3367_v10 = vld [vmem:[%s4816_s1 + $0x400] ss:$16 sps:$4 sm:$0xff]   ;;  %v3370_v11 = vld [vmem:[%s4816_s1 + $0x408] ss:$16 sps:$4 sm:$0xff]  }
  0x48   :  { %1658 = vmatprep.subr.bf16.mxu0 %v3285_v12  ;;  %1830 = vmatprep.subr.bf16.mxu1 %v3288_v13  ;;  %v3375_v12 = vld [vmem:[%s4816_s1 + $0x424] ss:$16 sps:$4 sm:$0xff]   ;;  %v3378_v13 = vld [vmem:[%s4816_s1 + $0x42c] ss:$16 sps:$4 sm:$0xff]  }
  0x4b   :  { %1659 = vmatpush1.bf16.msra.mxu0 %v3283_v14  ;;  %1831 = vmatpush1.bf16.msra.mxu1 %v3286_v15  ;;  %v4146_v14 = vld [vmem:[%s4817_s0 + $0x10] sm:$0xff] }
  0x4c   :  { %1660 = vmatprep.subr.bf16.mxu0 %v3291_v16  ;;  %1832 = vmatprep.subr.bf16.mxu1 %v3294_v17  ;;  %v4151_v15 = vld [vmem:[%s4817_s0 + $0x30] sm:$0xff] }
  0x4d   :  { %v2745_v16 = vcombine.high %v4146_v14, %v4151_v15  ;;  %v3373_v17 = vld [vmem:[%s4816_s1 + $0x420] ss:$16 sps:$4 sm:$0xff]  }
  0x4f   :  { %1661 = vmatpush1.bf16.msra.mxu0 %v3289_v18  ;;  %1833 = vmatpush1.bf16.msra.mxu1 %v3292_v19  ;;  %v3376_v18 = vld [vmem:[%s4816_s1 + $0x428] ss:$16 sps:$4 sm:$0xff]   ;;  %v3381_v19 = vld [vmem:[%s4816_s1 + $0x444] ss:$16 sps:$4 sm:$0xff]  }
  0x50   :  { %1662 = vmatprep.subr.bf16.mxu0 %v3297_v20  ;;  %1834 = vmatprep.subr.bf16.mxu1 %v3300_v21  ;;  %v3384_v20 = vld [vmem:[%s4816_s1 + $0x44c] ss:$16 sps:$4 sm:$0xff]   ;;  %v3379_v21 = vld [vmem:[%s4816_s1 + $0x440] ss:$16 sps:$4 sm:$0xff]  }
  0x53   :  { %1663 = vmatpush1.bf16.msra.mxu0 %v3295_v22  ;;  %1835 = vmatpush1.bf16.msra.mxu1 %v3298_v23  ;;  %v3382_v22 = vld [vmem:[%s4816_s1 + $0x448] ss:$16 sps:$4 sm:$0xff]   ;;  %v3387_v23 = vld [vmem:[%s4816_s1 + $0x464] ss:$16 sps:$4 sm:$0xff]  }
  0x54   :  { %1664 = vmatprep.subr.bf16.mxu0 %v3303_v24  ;;  %1836 = vmatprep.subr.bf16.mxu1 %v3306_v25  ;;  %v3390_v24 = vld [vmem:[%s4816_s1 + $0x46c] ss:$16 sps:$4 sm:$0xff]   ;;  %v3385_v25 = vld [vmem:[%s4816_s1 + $0x460] ss:$16 sps:$4 sm:$0xff]  }
  0x57   :  { %1665 = vmatpush1.bf16.msra.mxu0 %v3301_v26  ;;  %1837 = vmatpush1.bf16.msra.mxu1 %v3304_v27  ;;  %v3388_v26 = vld [vmem:[%s4816_s1 + $0x468] ss:$16 sps:$4 sm:$0xff]   ;;  %v3393_v27 = vld [vmem:[%s4816_s1 + $0x484] ss:$16 sps:$4 sm:$0xff]  }
  0x58   :  { %1666 = vmatprep.subr.bf16.mxu0 %v3309_v28  ;;  %1838 = vmatprep.subr.bf16.mxu1 %v3312_v29  ;;  %v3396_v28 = vld [vmem:[%s4816_s1 + $0x48c] ss:$16 sps:$4 sm:$0xff]   ;;  %v3391_v29 = vld [vmem:[%s4816_s1 + $0x480] ss:$16 sps:$4 sm:$0xff]  }
  0x5b   :  { %1667 = vmatpush1.bf16.msra.mxu0 %v3307_v32  ;;  %1839 = vmatpush1.bf16.msra.mxu1 %v3310_v33  ;;  %v3402_v32 = vld [vmem:[%s4816_s1 + $0x4ac] ss:$16 sps:$4 sm:$0xff]   ;;  %v3397_v33 = vld [vmem:[%s4816_s1 + $0x4a0] ss:$16 sps:$4 sm:$0xff]  }
  0x5c   :  { %1668 = vmatprep.subr.bf16.mxu0 %v3315_v35  ;;  %1840 = vmatprep.subr.bf16.mxu1 %v3318_v36  ;;  %v3405_v35 = vld [vmem:[%s4816_s1 + $0x4c4] ss:$16 sps:$4 sm:$0xff]   ;;  %v3408_v36 = vld [vmem:[%s4816_s1 + $0x4cc] ss:$16 sps:$4 sm:$0xff]  }
  0x5f   :  { %1669 = vmatpush1.bf16.msra.mxu0 %v3313_v37  ;;  %1841 = vmatpush1.bf16.msra.mxu1 %v3316_v38  ;;  %v3403_v37 = vld [vmem:[%s4816_s1 + $0x4c0] ss:$16 sps:$4 sm:$0xff]   ;;  %v3406_v38 = vld [vmem:[%s4816_s1 + $0x4c8] ss:$16 sps:$4 sm:$0xff]  }
  0x60   :  { %1670 = vmatprep.subr.bf16.mxu0 %v3321_v39  ;;  %1842 = vmatprep.subr.bf16.mxu1 %v3324_v40  ;;  %v3411_v39 = vld [vmem:[%s4816_s1 + $0x4e4] ss:$16 sps:$4 sm:$0xff]   ;;  %v3414_v40 = vld [vmem:[%s4816_s1 + $0x4ec] ss:$16 sps:$4 sm:$0xff]  }
  0x63   :  { %1671 = vmatpush1.bf16.msra.mxu0 %v3319_v41  ;;  %1843 = vmatpush1.bf16.msra.mxu1 %v3322_v42  ;;  %v3409_v41 = vld [vmem:[%s4816_s1 + $0x4e0] ss:$16 sps:$4 sm:$0xff]   ;;  %v3412_v42 = vld [vmem:[%s4816_s1 + $0x4e8] ss:$16 sps:$4 sm:$0xff]  }
  0x64   :  { %1672 = vmatprep.subr.bf16.mxu0 %v3327_v43  ;;  %1844 = vmatprep.subr.bf16.mxu1 %v3330_v44  ;;  %v3417_v43 = vld [vmem:[%s4816_s1 + $0x504] ss:$16 sps:$4 sm:$0xff]   ;;  %v3420_v44 = vld [vmem:[%s4816_s1 + $0x50c] ss:$16 sps:$4 sm:$0xff]  }
  0x67   :  { %1673 = vmatpush1.bf16.msra.mxu0 %v3325_v45  ;;  %1845 = vmatpush1.bf16.msra.mxu1 %v3328_v46  ;;  %v3415_v45 = vld [vmem:[%s4816_s1 + $0x500] ss:$16 sps:$4 sm:$0xff]   ;;  %v3418_v46 = vld [vmem:[%s4816_s1 + $0x508] ss:$16 sps:$4 sm:$0xff]  }
  0x68   :  { %1674 = vmatprep.subr.bf16.mxu0 %v3333_v47  ;;  %1846 = vmatprep.subr.bf16.mxu1 %v3336_v48  ;;  %v3423_v47 = vld [vmem:[%s4816_s1 + $0x524] ss:$16 sps:$4 sm:$0xff]   ;;  %v3426_v48 = vld [vmem:[%s4816_s1 + $0x52c] ss:$16 sps:$4 sm:$0xff]  }
  0x6b   :  { %1675 = vmatpush1.bf16.msra.mxu0 %v3331_v49  ;;  %1847 = vmatpush1.bf16.msra.mxu1 %v3334_v50  ;;  %v3421_v49 = vld [vmem:[%s4816_s1 + $0x520] ss:$16 sps:$4 sm:$0xff]   ;;  %v3424_v50 = vld [vmem:[%s4816_s1 + $0x528] ss:$16 sps:$4 sm:$0xff]  }
  0x6c   :  { %1676 = vmatprep.subr.bf16.mxu0 %v3339_v51  ;;  %1848 = vmatprep.subr.bf16.mxu1 %v3342_v52  ;;  %v3429_v51 = vld [vmem:[%s4816_s1 + $0x544] ss:$16 sps:$4 sm:$0xff]   ;;  %v3432_v52 = vld [vmem:[%s4816_s1 + $0x54c] ss:$16 sps:$4 sm:$0xff]  }
  0x6f   :  { %1677 = vmatpush1.bf16.msra.mxu0 %v3337_v53  ;;  %1849 = vmatpush1.bf16.msra.mxu1 %v3340_v54  ;;  %v3427_v53 = vld [vmem:[%s4816_s1 + $0x540] ss:$16 sps:$4 sm:$0xff]   ;;  %v3430_v54 = vld [vmem:[%s4816_s1 + $0x548] ss:$16 sps:$4 sm:$0xff]  }
  0x70   :  { %1678 = vmatprep.subr.bf16.mxu0 %v3345_v55  ;;  %1850 = vmatprep.subr.bf16.mxu1 %v3348_v56  ;;  %v3435_v55 = vld [vmem:[%s4816_s1 + $0x564] ss:$16 sps:$4 sm:$0xff]   ;;  %v3438_v56 = vld [vmem:[%s4816_s1 + $0x56c] ss:$16 sps:$4 sm:$0xff]  }
  0x73   :  { %1679 = vmatpush1.bf16.msra.mxu0 %v3343_v57  ;;  %1851 = vmatpush1.bf16.msra.mxu1 %v3346_v58  ;;  %v3433_v57 = vld [vmem:[%s4816_s1 + $0x560] ss:$16 sps:$4 sm:$0xff]   ;;  %v3436_v58 = vld [vmem:[%s4816_s1 + $0x568] ss:$16 sps:$4 sm:$0xff]  }
  0x74   :  { %1680 = vmatprep.subr.bf16.mxu0 %v3351_v59  ;;  %1852 = vmatprep.subr.bf16.mxu1 %v3354_v60  ;;  %v3441_v59 = vld [vmem:[%s4816_s1 + $0x584] ss:$16 sps:$4 sm:$0xff]   ;;  %v3444_v60 = vld [vmem:[%s4816_s1 + $0x58c] ss:$16 sps:$4 sm:$0xff]  }
  0x77   :  { %1681 = vmatpush1.bf16.msra.mxu0 %v3349_v61  ;;  %1853 = vmatpush1.bf16.msra.mxu1 %v3352_v62  ;;  %v3439_v61 = vld [vmem:[%s4816_s1 + $0x580] ss:$16 sps:$4 sm:$0xff]   ;;  %v3442_v62 = vld [vmem:[%s4816_s1 + $0x588] ss:$16 sps:$4 sm:$0xff]  }
  0x78   :  { %1682 = vmatprep.subr.bf16.mxu0 %v3357_v63  ;;  %1854 = vmatprep.subr.bf16.mxu1 %v3360_v0  ;;  %v3447_v63 = vld [vmem:[%s4816_s1 + $0x5a4] ss:$16 sps:$4 sm:$0xff]   ;;  %v3450_v0 = vld [vmem:[%s4816_s1 + $0x5ac] ss:$16 sps:$4 sm:$0xff]  }
  0x7b   :  { %1683 = vmatpush1.bf16.msra.mxu0 %v3355_v1  ;;  %1855 = vmatpush1.bf16.msra.mxu1 %v3358_v2  ;;  %v3445_v1 = vld [vmem:[%s4816_s1 + $0x5a0] ss:$16 sps:$4 sm:$0xff]   ;;  %v3448_v2 = vld [vmem:[%s4816_s1 + $0x5a8] ss:$16 sps:$4 sm:$0xff]  }
  0x7c   :  { %1684 = vmatprep.subr.bf16.mxu0 %v3363_v3  ;;  %1856 = vmatprep.subr.bf16.mxu1 %v3366_v4  ;;  %v3453_v3 = vld [vmem:[%s4816_s1 + $0x5c4] ss:$16 sps:$4 sm:$0xff]   ;;  %v3456_v4 = vld [vmem:[%s4816_s1 + $0x5cc] ss:$16 sps:$4 sm:$0xff]  }
  0x7f   :  { %1685 = vmatpush1.bf16.msra.mxu0 %v3361_v5  ;;  %1857 = vmatpush1.bf16.msra.mxu1 %v3364_v6  ;;  %v3451_v5 = vld [vmem:[%s4816_s1 + $0x5c0] ss:$16 sps:$4 sm:$0xff]   ;;  %v3454_v6 = vld [vmem:[%s4816_s1 + $0x5c8] ss:$16 sps:$4 sm:$0xff]  }
  0x80   :  { %1697 = vmatprep.subr.bf16.mxu0 %v3369_v7  ;;  %1869 = vmatprep.subr.bf16.mxu1 %v3372_v8  ;;  %v3459_v7 = vld [vmem:[%s4816_s1 + $0x5e4] ss:$16 sps:$4 sm:$0xff]   ;;  %v3462_v8 = vld [vmem:[%s4816_s1 + $0x5ec] ss:$16 sps:$4 sm:$0xff]  }
  0x82   :  { %1687 = vmatmul.mubr.bf16.vlgmr.msra.gmra.mrb[0].mxu0 %v2742_v9  ;;  %1859 = vmatmul.mubr.bf16.vlgmr.msra.gmra.mrb[0].mxu1 %v2742_v9  ;;  %v3457_v9 = vld [vmem:[%s4816_s1 + $0x5e0] ss:$16 sps:$4 sm:$0xff]  }
  0x83   :  { %1698 = vmatpush1.bf16.msra.mxu0 %v3367_v10  ;;  %1870 = vmatpush1.bf16.msra.mxu1 %v3370_v11  ;;  %v3460_v10 = vld [vmem:[%s4816_s1 + $0x5e8] ss:$16 sps:$4 sm:$0xff]   ;;  %v3465_v11 = vld [vmem:[%s4816_s1 + $0x604] ss:$16 sps:$4 sm:$0xff]  }
  0x84   :  { %1699 = vmatprep.subr.bf16.mxu0 %v3375_v12  ;;  %1871 = vmatprep.subr.bf16.mxu1 %v3378_v13  ;;  %v3468_v12 = vld [vmem:[%s4816_s1 + $0x60c] ss:$16 sps:$4 sm:$0xff]   ;;  %v3463_v13 = vld [vmem:[%s4816_s1 + $0x600] ss:$16 sps:$4 sm:$0xff]  }
  0x85   :  { %1729 = vmatprep.mubr.bf16.mxu0 %v2745_v16  ;;  %1901 = vmatprep.mubr.bf16.mxu1 %v2745_v16  ;;  %v3466_v16 = vld [vmem:[%s4816_s1 + $0x608] ss:$16 sps:$4 sm:$0xff]  }
  0x87   :  { %1700 = vmatpush1.bf16.msra.mxu0 %v3373_v17  ;;  %1872 = vmatpush1.bf16.msra.mxu1 %v3376_v18  ;;  %v2744_v17 = vcombine.low %v4146_v14, %v4151_v15  ;;  %v3471_v18 = vld [vmem:[%s4816_s1 + $0x624] ss:$16 sps:$4 sm:$0xff]   ;;  %v3469_v14 = vld [vmem:[%s4816_s1 + $0x620] ss:$16 sps:$4 sm:$0xff]   ;;  %v3472_v15 = vld [vmem:[%s4816_s1 + $0x628] ss:$16 sps:$4 sm:$0xff]  }
  0x88   :  { %1701 = vmatprep.subr.bf16.mxu0 %v3381_v19  ;;  %1873 = vmatprep.subr.bf16.mxu1 %v3384_v20  ;;  %v3474_v19 = vld [vmem:[%s4816_s1 + $0x62c] ss:$16 sps:$4 sm:$0xff]  }
  0x89   :  { %v4352_v20 = vld [vmem:[%s4817_s0 + $0x18] sm:$0xff] }
  0x8b   :  { %1702 = vmatpush1.bf16.msra.mxu0 %v3379_v21  ;;  %1874 = vmatpush1.bf16.msra.mxu1 %v3382_v22  ;;  %v4357_v21 = vld [vmem:[%s4817_s0 + $0x38] sm:$0xff] }
  0x8c   :  { %1703 = vmatprep.subr.bf16.mxu0 %v3387_v23  ;;  %1875 = vmatprep.subr.bf16.mxu1 %v3390_v24  ;;  %v2747_v22 = vcombine.high %v4352_v20, %v4357_v21  ;;  %v3477_v23 = vld [vmem:[%s4816_s1 + $0x644] ss:$16 sps:$4 sm:$0xff]   ;;  %v3480_v24 = vld [vmem:[%s4816_s1 + $0x64c] ss:$16 sps:$4 sm:$0xff]  }
  0x8f   :  { %1704 = vmatpush1.bf16.msra.mxu0 %v3385_v25  ;;  %1876 = vmatpush1.bf16.msra.mxu1 %v3388_v26  ;;  %v3475_v25 = vld [vmem:[%s4816_s1 + $0x640] ss:$16 sps:$4 sm:$0xff]   ;;  %v3478_v26 = vld [vmem:[%s4816_s1 + $0x648] ss:$16 sps:$4 sm:$0xff]  }
  0x90   :  { %1705 = vmatprep.subr.bf16.mxu0 %v3393_v27  ;;  %1877 = vmatprep.subr.bf16.mxu1 %v3396_v28  ;;  %v3483_v27 = vld [vmem:[%s4816_s1 + $0x664] ss:$16 sps:$4 sm:$0xff]   ;;  %v3486_v28 = vld [vmem:[%s4816_s1 + $0x66c] ss:$16 sps:$4 sm:$0xff]  }
  0x93   :  { %1706 = vmatpush1.bf16.msra.mxu0 %v3391_v29  ;;  %1878 = vmatpush1.bf16.msra.mxu1 %v3394_v30  ;;  %v3481_v29 = vld [vmem:[%s4816_s1 + $0x660] ss:$16 sps:$4 sm:$0xff]   ;;  %v3484_v30 = vld [vmem:[%s4816_s1 + $0x668] ss:$16 sps:$4 sm:$0xff]  }
  0x94   :  { %1707 = vmatprep.subr.bf16.mxu0 %v3399_v31  ;;  %1879 = vmatprep.subr.bf16.mxu1 %v3402_v32  ;;  %v3489_v31 = vld [vmem:[%s4816_s1 + $0x684] ss:$16 sps:$4 sm:$0xff]   ;;  %v3492_v32 = vld [vmem:[%s4816_s1 + $0x68c] ss:$16 sps:$4 sm:$0xff]  }
  0x97   :  { %1708 = vmatpush1.bf16.msra.mxu0 %v3397_v33  ;;  %1880 = vmatpush1.bf16.msra.mxu1 %v3400_v34  ;;  %v3487_v33 = vld [vmem:[%s4816_s1 + $0x680] ss:$16 sps:$4 sm:$0xff]   ;;  %v3490_v34 = vld [vmem:[%s4816_s1 + $0x688] ss:$16 sps:$4 sm:$0xff]  }
  0x98   :  { %1709 = vmatprep.subr.bf16.mxu0 %v3405_v35  ;;  %1881 = vmatprep.subr.bf16.mxu1 %v3408_v36  ;;  %v3495_v35 = vld [vmem:[%s4816_s1 + $0x6a4] ss:$16 sps:$4 sm:$0xff]   ;;  %v3498_v36 = vld [vmem:[%s4816_s1 + $0x6ac] ss:$16 sps:$4 sm:$0xff]  }
  0x9b   :  { %1710 = vmatpush1.bf16.msra.mxu0 %v3403_v37  ;;  %1882 = vmatpush1.bf16.msra.mxu1 %v3406_v38  ;;  %v3493_v37 = vld [vmem:[%s4816_s1 + $0x6a0] ss:$16 sps:$4 sm:$0xff]   ;;  %v3496_v38 = vld [vmem:[%s4816_s1 + $0x6a8] ss:$16 sps:$4 sm:$0xff]  }
  0x9c   :  { %1711 = vmatprep.subr.bf16.mxu0 %v3411_v39  ;;  %1883 = vmatprep.subr.bf16.mxu1 %v3414_v40  ;;  %v3501_v39 = vld [vmem:[%s4816_s1 + $0x6c4] ss:$16 sps:$4 sm:$0xff]   ;;  %v3504_v40 = vld [vmem:[%s4816_s1 + $0x6cc] ss:$16 sps:$4 sm:$0xff]  }
  0x9f   :  { %1712 = vmatpush1.bf16.msra.mxu0 %v3409_v41  ;;  %1884 = vmatpush1.bf16.msra.mxu1 %v3412_v42  ;;  %v3499_v41 = vld [vmem:[%s4816_s1 + $0x6c0] ss:$16 sps:$4 sm:$0xff]   ;;  %v3502_v42 = vld [vmem:[%s4816_s1 + $0x6c8] ss:$16 sps:$4 sm:$0xff]  }
  0xa0   :  { %1713 = vmatprep.subr.bf16.mxu0 %v3417_v43  ;;  %1885 = vmatprep.subr.bf16.mxu1 %v3420_v44  ;;  %v3507_v43 = vld [vmem:[%s4816_s1 + $0x6e4] ss:$16 sps:$4 sm:$0xff]   ;;  %v3510_v44 = vld [vmem:[%s4816_s1 + $0x6ec] ss:$16 sps:$4 sm:$0xff]  }
  0xa3   :  { %1714 = vmatpush1.bf16.msra.mxu0 %v3415_v45  ;;  %1886 = vmatpush1.bf16.msra.mxu1 %v3418_v46  ;;  %v3505_v45 = vld [vmem:[%s4816_s1 + $0x6e0] ss:$16 sps:$4 sm:$0xff]   ;;  %v3508_v46 = vld [vmem:[%s4816_s1 + $0x6e8] ss:$16 sps:$4 sm:$0xff]  }
  0xa4   :  { %1715 = vmatprep.subr.bf16.mxu0 %v3423_v47  ;;  %1887 = vmatprep.subr.bf16.mxu1 %v3426_v48  ;;  %v3513_v47 = vld [vmem:[%s4816_s1 + $0x704] ss:$16 sps:$4 sm:$0xff]   ;;  %v3516_v48 = vld [vmem:[%s4816_s1 + $0x70c] ss:$16 sps:$4 sm:$0xff]  }
  0xa7   :  { %1716 = vmatpush1.bf16.msra.mxu0 %v3421_v49  ;;  %1888 = vmatpush1.bf16.msra.mxu1 %v3424_v50  ;;  %v3511_v49 = vld [vmem:[%s4816_s1 + $0x700] ss:$16 sps:$4 sm:$0xff]   ;;  %v3514_v50 = vld [vmem:[%s4816_s1 + $0x708] ss:$16 sps:$4 sm:$0xff]  }
  0xa8   :  { %1717 = vmatprep.subr.bf16.mxu0 %v3429_v51  ;;  %1889 = vmatprep.subr.bf16.mxu1 %v3432_v52  ;;  %v3519_v51 = vld [vmem:[%s4816_s1 + $0x724] ss:$16 sps:$4 sm:$0xff]   ;;  %v3522_v52 = vld [vmem:[%s4816_s1 + $0x72c] ss:$16 sps:$4 sm:$0xff]  }
  0xab   :  { %1718 = vmatpush1.bf16.msra.mxu0 %v3427_v53  ;;  %1890 = vmatpush1.bf16.msra.mxu1 %v3430_v54  ;;  %v3517_v53 = vld [vmem:[%s4816_s1 + $0x720] ss:$16 sps:$4 sm:$0xff]   ;;  %v3520_v54 = vld [vmem:[%s4816_s1 + $0x728] ss:$16 sps:$4 sm:$0xff]  }
  0xac   :  { %1719 = vmatprep.subr.bf16.mxu0 %v3435_v55  ;;  %1891 = vmatprep.subr.bf16.mxu1 %v3438_v56  ;;  %v3525_v55 = vld [vmem:[%s4816_s1 + $0x744] ss:$16 sps:$4 sm:$0xff]   ;;  %v3528_v56 = vld [vmem:[%s4816_s1 + $0x74c] ss:$16 sps:$4 sm:$0xff]  }
  0xaf   :  { %1720 = vmatpush1.bf16.msra.mxu0 %v3433_v57  ;;  %1892 = vmatpush1.bf16.msra.mxu1 %v3436_v58  ;;  %v3523_v57 = vld [vmem:[%s4816_s1 + $0x740] ss:$16 sps:$4 sm:$0xff]   ;;  %v3526_v58 = vld [vmem:[%s4816_s1 + $0x748] ss:$16 sps:$4 sm:$0xff]  }
  0xb0   :  { %1721 = vmatprep.subr.bf16.mxu0 %v3441_v59  ;;  %1893 = vmatprep.subr.bf16.mxu1 %v3444_v60  ;;  %v3531_v59 = vld [vmem:[%s4816_s1 + $0x764] ss:$16 sps:$4 sm:$0xff]   ;;  %v3534_v60 = vld [vmem:[%s4816_s1 + $0x76c] ss:$16 sps:$4 sm:$0xff]  }
  0xb3   :  { %1722 = vmatpush1.bf16.msra.mxu0 %v3439_v61  ;;  %1894 = vmatpush1.bf16.msra.mxu1 %v3442_v62  ;;  %v3529_v61 = vld [vmem:[%s4816_s1 + $0x760] ss:$16 sps:$4 sm:$0xff]   ;;  %v3532_v62 = vld [vmem:[%s4816_s1 + $0x768] ss:$16 sps:$4 sm:$0xff]  }
  0xb4   :  { %1723 = vmatprep.subr.bf16.mxu0 %v3447_v63  ;;  %1895 = vmatprep.subr.bf16.mxu1 %v3450_v0  ;;  %v3537_v63 = vld [vmem:[%s4816_s1 + $0x784] ss:$16 sps:$4 sm:$0xff]   ;;  %v3540_v0 = vld [vmem:[%s4816_s1 + $0x78c] ss:$16 sps:$4 sm:$0xff]  }
  0xb7   :  { %1724 = vmatpush1.bf16.msra.mxu0 %v3445_v1  ;;  %1896 = vmatpush1.bf16.msra.mxu1 %v3448_v2  ;;  %v3535_v1 = vld [vmem:[%s4816_s1 + $0x780] ss:$16 sps:$4 sm:$0xff]   ;;  %v3538_v2 = vld [vmem:[%s4816_s1 + $0x788] ss:$16 sps:$4 sm:$0xff]  }
  0xb8   :  { %1725 = vmatprep.subr.bf16.mxu0 %v3453_v3  ;;  %1897 = vmatprep.subr.bf16.mxu1 %v3456_v4  ;;  %v3543_v3 = vld [vmem:[%s4816_s1 + $0x7a4] ss:$16 sps:$4 sm:$0xff]   ;;  %v3546_v4 = vld [vmem:[%s4816_s1 + $0x7ac] ss:$16 sps:$4 sm:$0xff]  }
  0xbb   :  { %1726 = vmatpush1.bf16.msra.mxu0 %v3451_v5  ;;  %1898 = vmatpush1.bf16.msra.mxu1 %v3454_v6  ;;  %v3541_v5 = vld [vmem:[%s4816_s1 + $0x7a0] ss:$16 sps:$4 sm:$0xff]   ;;  %v3544_v6 = vld [vmem:[%s4816_s1 + $0x7a8] ss:$16 sps:$4 sm:$0xff]  }
  0xbc   :  { %1727 = vmatprep.subr.bf16.mxu0 %v3459_v7  ;;  %1899 = vmatprep.subr.bf16.mxu1 %v3462_v8  ;;  %v3549_v7 = vld [vmem:[%s4816_s1 + $0x7c4] ss:$16 sps:$4 sm:$0xff]   ;;  %v3552_v8 = vld [vmem:[%s4816_s1 + $0x7cc] ss:$16 sps:$4 sm:$0xff]  }
  0xbf   :  { %1728 = vmatpush1.bf16.msra.mxu0 %v3457_v9  ;;  %1900 = vmatpush1.bf16.msra.mxu1 %v3460_v10  ;;  %v3547_v9 = vld [vmem:[%s4816_s1 + $0x7c0] ss:$16 sps:$4 sm:$0xff]   ;;  %v3550_v10 = vld [vmem:[%s4816_s1 + $0x7c8] ss:$16 sps:$4 sm:$0xff]  }
  0xc0   :  { %1740 = vmatprep.subr.bf16.mxu0 %v3465_v11  ;;  %1912 = vmatprep.subr.bf16.mxu1 %v3468_v12  ;;  %v3555_v11 = vld [vmem:[%s4816_s1 + $0x7e4] ss:$16 sps:$4 sm:$0xff]   ;;  %v3558_v12 = vld [vmem:[%s4816_s1 + $0x7ec] ss:$16 sps:$4 sm:$0xff]  }
  0xc2   :  { %1730 = vmatmul.mubr.bf16.vlgmr.msra.gmra.mrb[0].mxu0 %v2744_v17  ;;  %1902 = vmatmul.mubr.bf16.vlgmr.msra.gmra.mrb[0].mxu1 %v2744_v17  ;;  %v3561_v17 = vld [vmem:[%s4818_s2 + $0x4] ss:$8 sps:$4 sm:$0xff]  }
  0xc3   :  { %1741 = vmatpush1.bf16.msra.mxu0 %v3463_v13  ;;  %1913 = vmatpush1.bf16.msra.mxu1 %v3466_v16  ;;  %v3553_v13 = vld [vmem:[%s4816_s1 + $0x7e0] ss:$16 sps:$4 sm:$0xff]   ;;  %v3556_v16 = vld [vmem:[%s4816_s1 + $0x7e8] ss:$16 sps:$4 sm:$0xff]  }
  0xc4   :  { %1742 = vmatprep.subr.bf16.mxu0 %v3471_v18  ;;  %1914 = vmatprep.subr.bf16.mxu1 %v3474_v19  ;;  %v2746_v18 = vcombine.low %v4352_v20, %v4357_v21  ;;  %v3559_v19 = vld [vmem:[%s4818_s2] ss:$8 sps:$4 sm:$0xff]   ;;  %v3567_v20 = vld [vmem:[%s4818_s2 + $0x24] ss:$8 sps:$4 sm:$0xff]  }
  0xc5   :  { %1772 = vmatprep.mubr.bf16.mxu0 %v2747_v22  ;;  %1944 = vmatprep.mubr.bf16.mxu1 %v2747_v22  ;;  %v3565_v21 = vld [vmem:[%s4818_s2 + $0x20] ss:$8 sps:$4 sm:$0xff]   ;;  %v3570_v22 = vld [vmem:[%s4818_s2 + $0x34] ss:$8 sps:$4 sm:$0xff]  }
  0xc7   :  { %1743 = vmatpush1.bf16.msra.mxu0 %v3469_v14  ;;  %1915 = vmatpush1.bf16.msra.mxu1 %v3472_v15  ;;  %v3564_v14 = vld [vmem:[%s4818_s2 + $0x14] ss:$8 sps:$4 sm:$0xff]   ;;  %v3562_v15 = vld [vmem:[%s4818_s2 + $0x10] ss:$8 sps:$4 sm:$0xff]  }
  0xc8   :  { %1744 = vmatprep.subr.bf16.mxu0 %v3477_v23  ;;  %1916 = vmatprep.subr.bf16.mxu1 %v3480_v24  ;;  %v3568_v23 = vld [vmem:[%s4818_s2 + $0x30] ss:$8 sps:$4 sm:$0xff]   ;;  %v3573_v24 = vld [vmem:[%s4818_s2 + $0x44] ss:$8 sps:$4 sm:$0xff]  }
  0xcb   :  { %1745 = vmatpush1.bf16.msra.mxu0 %v3475_v25  ;;  %1917 = vmatpush1.bf16.msra.mxu1 %v3478_v26  ;;  %v3571_v25 = vld [vmem:[%s4818_s2 + $0x40] ss:$8 sps:$4 sm:$0xff]   ;;  %v3576_v26 = vld [vmem:[%s4818_s2 + $0x54] ss:$8 sps:$4 sm:$0xff]  }
  0xcc   :  { %1746 = vmatprep.subr.bf16.mxu0 %v3483_v27  ;;  %1918 = vmatprep.subr.bf16.mxu1 %v3486_v28  ;;  %v3574_v27 = vld [vmem:[%s4818_s2 + $0x50] ss:$8 sps:$4 sm:$0xff]   ;;  %v3579_v28 = vld [vmem:[%s4818_s2 + $0x64] ss:$8 sps:$4 sm:$0xff]  }
  0xcf   :  { %1747 = vmatpush1.bf16.msra.mxu0 %v3481_v29  ;;  %1919 = vmatpush1.bf16.msra.mxu1 %v3484_v30  ;;  %v3577_v29 = vld [vmem:[%s4818_s2 + $0x60] ss:$8 sps:$4 sm:$0xff]   ;;  %v3582_v30 = vld [vmem:[%s4818_s2 + $0x74] ss:$8 sps:$4 sm:$0xff]  }
  0xd0   :  { %1748 = vmatprep.subr.bf16.mxu0 %v3489_v31  ;;  %1920 = vmatprep.subr.bf16.mxu1 %v3492_v32  ;;  %v3580_v31 = vld [vmem:[%s4818_s2 + $0x70] ss:$8 sps:$4 sm:$0xff]   ;;  %v3585_v32 = vld [vmem:[%s4818_s2 + $0x84] ss:$8 sps:$4 sm:$0xff]  }
  0xd3   :  { %1749 = vmatpush1.bf16.msra.mxu0 %v3487_v33  ;;  %1921 = vmatpush1.bf16.msra.mxu1 %v3490_v34  ;;  %v3583_v33 = vld [vmem:[%s4818_s2 + $0x80] ss:$8 sps:$4 sm:$0xff]   ;;  %v3588_v34 = vld [vmem:[%s4818_s2 + $0x94] ss:$8 sps:$4 sm:$0xff]  }
  0xd4   :  { %1750 = vmatprep.subr.bf16.mxu0 %v3495_v35  ;;  %1922 = vmatprep.subr.bf16.mxu1 %v3498_v36  ;;  %v3586_v35 = vld [vmem:[%s4818_s2 + $0x90] ss:$8 sps:$4 sm:$0xff]   ;;  %v3591_v36 = vld [vmem:[%s4818_s2 + $0xa4] ss:$8 sps:$4 sm:$0xff]  }
  0xd7   :  { %1751 = vmatpush1.bf16.msra.mxu0 %v3493_v37  ;;  %1923 = vmatpush1.bf16.msra.mxu1 %v3496_v38  ;;  %v3589_v37 = vld [vmem:[%s4818_s2 + $0xa0] ss:$8 sps:$4 sm:$0xff]   ;;  %v3594_v38 = vld [vmem:[%s4818_s2 + $0xb4] ss:$8 sps:$4 sm:$0xff]  }
  0xd8   :  { %1752 = vmatprep.subr.bf16.mxu0 %v3501_v39  ;;  %1924 = vmatprep.subr.bf16.mxu1 %v3504_v40  ;;  %v3592_v39 = vld [vmem:[%s4818_s2 + $0xb0] ss:$8 sps:$4 sm:$0xff]   ;;  %v3597_v40 = vld [vmem:[%s4818_s2 + $0xc4] ss:$8 sps:$4 sm:$0xff]  }
  0xdb   :  { %1753 = vmatpush1.bf16.msra.mxu0 %v3499_v41  ;;  %1925 = vmatpush1.bf16.msra.mxu1 %v3502_v42  ;;  %v3595_v41 = vld [vmem:[%s4818_s2 + $0xc0] ss:$8 sps:$4 sm:$0xff]   ;;  %v3600_v42 = vld [vmem:[%s4818_s2 + $0xd4] ss:$8 sps:$4 sm:$0xff]  }
  0xdc   :  { %1754 = vmatprep.subr.bf16.mxu0 %v3507_v43  ;;  %1926 = vmatprep.subr.bf16.mxu1 %v3510_v44  ;;  %v3598_v43 = vld [vmem:[%s4818_s2 + $0xd0] ss:$8 sps:$4 sm:$0xff]   ;;  %v3603_v44 = vld [vmem:[%s4818_s2 + $0xe4] ss:$8 sps:$4 sm:$0xff]  }
  0xdf   :  { %1755 = vmatpush1.bf16.msra.mxu0 %v3505_v45  ;;  %1927 = vmatpush1.bf16.msra.mxu1 %v3508_v46  ;;  %v3601_v45 = vld [vmem:[%s4818_s2 + $0xe0] ss:$8 sps:$4 sm:$0xff]   ;;  %v3606_v46 = vld [vmem:[%s4818_s2 + $0xf4] ss:$8 sps:$4 sm:$0xff]  }
  0xe0   :  { %1756 = vmatprep.subr.bf16.mxu0 %v3513_v47  ;;  %1928 = vmatprep.subr.bf16.mxu1 %v3516_v48  ;;  %v3604_v47 = vld [vmem:[%s4818_s2 + $0xf0] ss:$8 sps:$4 sm:$0xff]   ;;  %v3609_v48 = vld [vmem:[%s4818_s2 + $0x104] ss:$8 sps:$4 sm:$0xff]  }
  0xe3   :  { %1757 = vmatpush1.bf16.msra.mxu0 %v3511_v49  ;;  %1929 = vmatpush1.bf16.msra.mxu1 %v3514_v50  ;;  %v3655_v49 = vld [vmem:[%s4819_s3 + $0x40] sm:$0xff]  }
  0xe4   :  { %1758 = vmatprep.subr.bf16.mxu0 %v3519_v51  ;;  %1930 = vmatprep.subr.bf16.mxu1 %v3522_v52  ;;  %v3656_v50 = vld [vmem:[%s4819_s3] sm:$0xff]   ;;  %v3657_v51 = vld [vmem:[%s4819_s3 + $0x48] sm:$0xff]  }
  0xe5   :  { %v3658_v52 = vld [vmem:[%s4819_s3 + $0x8] sm:$0xff]  }
  0xe7   :  { %1759 = vmatpush1.bf16.msra.mxu0 %v3517_v53  ;;  %1931 = vmatpush1.bf16.msra.mxu1 %v3520_v54  ;;  %v3659_v53 = vld [vmem:[%s4819_s3 + $0x50] sm:$0xff]  }
  0xe8   :  { %1760 = vmatprep.subr.bf16.mxu0 %v3525_v55  ;;  %1932 = vmatprep.subr.bf16.mxu1 %v3528_v56  ;;  %v3660_v54 = vld [vmem:[%s4819_s3 + $0x10] sm:$0xff]   ;;  %v3661_v55 = vld [vmem:[%s4819_s3 + $0x58] sm:$0xff]  }
  0xe9   :  { %v3662_v56 = vld [vmem:[%s4819_s3 + $0x18] sm:$0xff]  }
  0xeb   :  { %1761 = vmatpush1.bf16.msra.mxu0 %v3523_v57  ;;  %1933 = vmatpush1.bf16.msra.mxu1 %v3526_v58  ;;  %v3663_v57 = vld [vmem:[%s4819_s3 + $0x60] sm:$0xff]  }
  0xec   :  { %1762 = vmatprep.subr.bf16.mxu0 %v3531_v59  ;;  %1934 = vmatprep.subr.bf16.mxu1 %v3534_v60  ;;  %v3664_v58 = vld [vmem:[%s4819_s3 + $0x20] sm:$0xff]   ;;  %v3665_v59 = vld [vmem:[%s4819_s3 + $0x68] sm:$0xff]  }
  0xed   :  { %v3666_v60 = vld [vmem:[%s4819_s3 + $0x28] sm:$0xff]  }
  0xef   :  { %1763 = vmatpush1.bf16.msra.mxu0 %v3529_v61  ;;  %1935 = vmatpush1.bf16.msra.mxu1 %v3532_v62 }
  0xf0   :  { %1764 = vmatprep.subr.bf16.mxu0 %v3537_v63  ;;  %1936 = vmatprep.subr.bf16.mxu1 %v3540_v0 }
  0xf3   :  { %1765 = vmatpush1.bf16.msra.mxu0 %v3535_v1  ;;  %1937 = vmatpush1.bf16.msra.mxu1 %v3538_v2 }
  0xf4   :  { %1766 = vmatprep.subr.bf16.mxu0 %v3543_v3  ;;  %1938 = vmatprep.subr.bf16.mxu1 %v3546_v4 }
  0xf7   :  { %1767 = vmatpush1.bf16.msra.mxu0 %v3541_v5  ;;  %1939 = vmatpush1.bf16.msra.mxu1 %v3544_v6 }
  0xf8   :  { %1768 = vmatprep.subr.bf16.mxu0 %v3549_v7  ;;  %1940 = vmatprep.subr.bf16.mxu1 %v3552_v8 }
  0xfb   :  { %1769 = vmatpush1.bf16.msra.mxu0 %v3547_v9  ;;  %1941 = vmatpush1.bf16.msra.mxu1 %v3550_v10 }
  0xfc   :  { %1770 = vmatprep.subr.bf16.mxu0 %v3555_v11  ;;  %1942 = vmatprep.subr.bf16.mxu1 %v3558_v12 }
  0xff   :  { %1771 = vmatpush1.bf16.msra.mxu0 %v3553_v13  ;;  %1943 = vmatpush1.bf16.msra.mxu1 %v3556_v16 }
 0x100   :  { %2351 = vmatprep.subr.bf16.mxu0 %v3561_v17  ;;  %3094 = vmatprep.subr.bf16.mxu1 %v3655_v49  ;;  %v3668_v49 = vld [vmem:[%s4819_s3 + $0x30] sm:$0xff]  }
 0x102   :  { %1773 = vmatmul.mubr.bf16.vlgmr.msra.gmra.mrb[0].mxu0 %v2746_v18  ;;  %1945 = vmatmul.mubr.bf16.vlgmr.msra.gmra.mrb[0].mxu1 %v2746_v18 }
 0x103   :  { %2352 = vmatpush1.bf16.msra.mxu0 %v3559_v19  ;;  %3095 = vmatpush3.bf16.msra.mxu1 %v3656_v50  ;;  %v3607_v19 = vld [vmem:[%s4818_s2 + $0x100] ss:$8 sps:$4 sm:$0xff]   ;;  %v3669_v50 = vld [vmem:[%s4819_s3 + $0x78] sm:$0xff]  }
 0x104   :  { %2353 = vmatprep.subr.bf16.mxu0 %v3564_v14  ;;  %3096 = vmatprep.subr.bf16.mxu1 %v3657_v51  ;;  %v3612_v14 = vld [vmem:[%s4818_s2 + $0x114] ss:$8 sps:$4 sm:$0xff]  }
 0x105   :  { %v3670_v51 = vld [vmem:[%s4819_s3 + $0x38] sm:$0xff]  }
 0x107   :  { %2354 = vmatpush1.bf16.msra.mxu0 %v3562_v15  ;;  %3097 = vmatpush3.bf16.msra.mxu1 %v3658_v52  ;;  %v3610_v15 = vld [vmem:[%s4818_s2 + $0x110] ss:$8 sps:$4 sm:$0xff]   ;;  %v3679_v52 = vmov 0.0  }
 0x108   :  { %2355 = vmatprep.subr.bf16.mxu0 %v3567_v20  ;;  %3098 = vmatprep.subr.bf16.mxu1 %v3659_v53  ;;  %v3615_v20 = vld [vmem:[%s4818_s2 + $0x124] ss:$8 sps:$4 sm:$0xff]  }
 0x10b   :  { %2356 = vmatpush1.bf16.msra.mxu0 %v3565_v21  ;;  %3099 = vmatpush3.bf16.msra.mxu1 %v3660_v54  ;;  %v3613_v21 = vld [vmem:[%s4818_s2 + $0x120] ss:$8 sps:$4 sm:$0xff]  }
 0x10c   :  { %2357 = vmatprep.subr.bf16.mxu0 %v3570_v22  ;;  %3100 = vmatprep.subr.bf16.mxu1 %v3661_v55  ;;  %v3618_v22 = vld [vmem:[%s4818_s2 + $0x134] ss:$8 sps:$4 sm:$0xff]  }
 0x10f   :  { %2358 = vmatpush1.bf16.msra.mxu0 %v3568_v23  ;;  %3101 = vmatpush3.bf16.msra.mxu1 %v3662_v56  ;;  %v3616_v23 = vld [vmem:[%s4818_s2 + $0x130] ss:$8 sps:$4 sm:$0xff]  }
 0x110   :  { %2359 = vmatprep.subr.bf16.mxu0 %v3573_v24  ;;  %3102 = vmatprep.subr.bf16.mxu1 %v3663_v57  ;;  %v3621_v24 = vld [vmem:[%s4818_s2 + $0x144] ss:$8 sps:$4 sm:$0xff]  }
 0x113   :  { %2360 = vmatpush1.bf16.msra.mxu0 %v3571_v25  ;;  %3103 = vmatpush3.bf16.msra.mxu1 %v3664_v58  ;;  %v3619_v25 = vld [vmem:[%s4818_s2 + $0x140] ss:$8 sps:$4 sm:$0xff]  }
 0x114   :  { %2361 = vmatprep.subr.bf16.mxu0 %v3576_v26  ;;  %3104 = vmatprep.subr.bf16.mxu1 %v3665_v59  ;;  %v3624_v26 = vld [vmem:[%s4818_s2 + $0x154] ss:$8 sps:$4 sm:$0xff]  }
 0x117   :  { %2362 = vmatpush1.bf16.msra.mxu0 %v3574_v27  ;;  %3105 = vmatpush3.bf16.msra.mxu1 %v3666_v60  ;;  %v3622_v27 = vld [vmem:[%s4818_s2 + $0x150] ss:$8 sps:$4 sm:$0xff]  }
 0x118   :  { %2363 = vmatprep.subr.bf16.mxu0 %v3579_v28  ;;  %v3627_v28 = vld [vmem:[%s4818_s2 + $0x164] ss:$8 sps:$4 sm:$0xff]  }
 0x11b   :  { %2364 = vmatpush1.bf16.msra.mxu0 %v3577_v29  ;;  %v3625_v29 = vld [vmem:[%s4818_s2 + $0x160] ss:$8 sps:$4 sm:$0xff]  }
 0x11c   :  { %2365 = vmatprep.subr.bf16.mxu0 %v3582_v30  ;;  %v3630_v30 = vld [vmem:[%s4818_s2 + $0x174] ss:$8 sps:$4 sm:$0xff]  }
 0x11f   :  { %2366 = vmatpush1.bf16.msra.mxu0 %v3580_v31  ;;  %v3628_v31 = vld [vmem:[%s4818_s2 + $0x170] ss:$8 sps:$4 sm:$0xff]  }
 0x120   :  { %2367 = vmatprep.subr.bf16.mxu0 %v3585_v32  ;;  %v3633_v32 = vld [vmem:[%s4818_s2 + $0x184] ss:$8 sps:$4 sm:$0xff]  }
 0x123   :  { %2368 = vmatpush1.bf16.msra.mxu0 %v3583_v33  ;;  %v3631_v33 = vld [vmem:[%s4818_s2 + $0x180] ss:$8 sps:$4 sm:$0xff]  }
 0x124   :  { %2369 = vmatprep.subr.bf16.mxu0 %v3588_v34  ;;  %v3636_v34 = vld [vmem:[%s4818_s2 + $0x194] ss:$8 sps:$4 sm:$0xff]  }
 0x127   :  { %2370 = vmatpush1.bf16.msra.mxu0 %v3586_v35  ;;  %v3634_v35 = vld [vmem:[%s4818_s2 + $0x190] ss:$8 sps:$4 sm:$0xff]  }
 0x128   :  { %2371 = vmatprep.subr.bf16.mxu0 %v3591_v36  ;;  %v3639_v36 = vld [vmem:[%s4818_s2 + $0x1a4] ss:$8 sps:$4 sm:$0xff]  }
 0x12b   :  { %2372 = vmatpush1.bf16.msra.mxu0 %v3589_v37  ;;  %v3637_v37 = vld [vmem:[%s4818_s2 + $0x1a0] ss:$8 sps:$4 sm:$0xff]  }
 0x12c   :  { %2373 = vmatprep.subr.bf16.mxu0 %v3594_v38  ;;  %v3642_v38 = vld [vmem:[%s4818_s2 + $0x1b4] ss:$8 sps:$4 sm:$0xff]  }
 0x12f   :  { %2374 = vmatpush1.bf16.msra.mxu0 %v3592_v39  ;;  %v3640_v39 = vld [vmem:[%s4818_s2 + $0x1b0] ss:$8 sps:$4 sm:$0xff]  }
 0x130   :  { %2375 = vmatprep.subr.bf16.mxu0 %v3597_v40  ;;  %v3645_v40 = vld [vmem:[%s4818_s2 + $0x1c4] ss:$8 sps:$4 sm:$0xff]  }
 0x133   :  { %2376 = vmatpush1.bf16.msra.mxu0 %v3595_v41  ;;  %v3643_v41 = vld [vmem:[%s4818_s2 + $0x1c0] ss:$8 sps:$4 sm:$0xff]  }
 0x134   :  { %2377 = vmatprep.subr.bf16.mxu0 %v3600_v42  ;;  %v3648_v42 = vld [vmem:[%s4818_s2 + $0x1d4] ss:$8 sps:$4 sm:$0xff]  }
 0x137   :  { %2378 = vmatpush1.bf16.msra.mxu0 %v3598_v43  ;;  %v3646_v43 = vld [vmem:[%s4818_s2 + $0x1d0] ss:$8 sps:$4 sm:$0xff]  }
 0x138   :  { %2379 = vmatprep.subr.bf16.mxu0 %v3603_v44  ;;  %v3651_v44 = vld [vmem:[%s4818_s2 + $0x1e4] ss:$8 sps:$4 sm:$0xff]  }
 0x13b   :  { %2380 = vmatpush1.bf16.msra.mxu0 %v3601_v45  ;;  %v3649_v45 = vld [vmem:[%s4818_s2 + $0x1e0] ss:$8 sps:$4 sm:$0xff]  }
 0x13c   :  { %2381 = vmatprep.subr.bf16.mxu0 %v3606_v46  ;;  %v3654_v46 = vld [vmem:[%s4818_s2 + $0x1f4] ss:$8 sps:$4 sm:$0xff]  }
 0x13f   :  { %2382 = vmatpush1.bf16.msra.mxu0 %v3604_v47  ;;  %v3652_v47 = vld [vmem:[%s4818_s2 + $0x1f0] ss:$8 sps:$4 sm:$0xff]  }
 0x140   :  { %2394 = vmatprep.subr.bf16.mxu0 %v3609_v48  ;;  %v3667_v48 = vld [vmem:[%s4819_s3 + $0x70] sm:$0xff]  }
 0x141   :  { %3106 = vmatprep.subr.bf16.mxu1 %v3667_v48 }
 0x142   :  { %3107 = vmatpush3.bf16.msra.mxu1 %v3668_v49 }
 0x143   :  { %3108 = vmatprep.subr.bf16.mxu1 %v3669_v50 }
 0x146   :  { %3109 = vmatpush3.bf16.msra.mxu1 %v3670_v51 }
 0x147   :  { %3125 = vmatprep.subr.bf16.mxu1 %v3679_v52 }
 0x1d5   :  { %v1774_v61 = vpop.f32.mrb[0].mxu0  ;;  %v1946_v62 = vpop.f32.mrb[0].mxu1 }
 0x1d6   :  { %v1776_v63 = vpop.f32.mrb[1].mxu0  ;;  %v1948_v0 = vpop.f32.mrb[1].mxu1  ;;  %v1955_v3 = vmax.f32 %v1774_v61, 0.0  ;;  %v1957_v4 = vmax.f32 %v1946_v62, 0.0 }
 0x1d7   :  { %v1778_v1 = vpop.f32.mrb[2].mxu0  ;;  %v1950_v2 = vpop.f32.mrb[2].mxu1  ;;  %v1956_v9 = vmax.f32 %v1776_v63, 0.0  ;;  %v1958_v10 = vmax.f32 %v1948_v0, 0.0  ;;  %v3671_v63 = vld [vmem:[%s4820_s5] sm:$0xff]   ;;  %v3672_v0 = vld [vmem:[%s4820_s5 + $0x8] sm:$0xff]  }
 0x1d8   :  { %v1959_v5 = vmax.f32 %v1778_v1, 0.0  ;;  %v1961_v6 = vmax.f32 %v1950_v2, 0.0  ;;  %v1780_v7 = vpop.f32.mrb[3].mxu0  ;;  %v1952_v8 = vpop.f32.mrb[3].mxu1  ;;  %v3673_v1 = vld [vmem:[%s4820_s5 + $0x10] sm:$0xff]   ;;  %v3674_v2 = vld [vmem:[%s4820_s5 + $0x18] sm:$0xff]  }
 0x1d9   :  { %v1960_v11 = vmax.f32 %v1780_v7, 0.0  ;;  %v1962_v12 = vmax.f32 %v1952_v8, 0.0  ;;  %v3068_v8 = vld [vmem:[%s4821_s4] ss:$0 sm:$0xff] }
 0x1da   :  { %v1963_v13 = vpack.c.bf16 %v1959_v5, %v1955_v3  ;;  %v4672_v16 = vpack.c.bf16 %v1961_v6, %v1957_v4  ;;  %v3675_v3 = vld [vmem:[%s4820_s5 + $0x20] sm:$0xff]   ;;  %v3676_v4 = vld [vmem:[%s4820_s5 + $0x28] sm:$0xff]   ;;  %v3677_v5 = vld [vmem:[%s4820_s5 + $0x30] sm:$0xff]  }
 0x1db   :  { %v1964_v17 = vpack.c.bf16 %v1960_v11, %v1956_v9  ;;  %v1966_v18 = vpack.c.bf16 %v1962_v12, %v1958_v10  ;;  %v3678_v6 = vld [vmem:[%s4820_s5 + $0x38] sm:$0xff]  }
 0x1dd   :  { %2383 = vmatprep.mubr.bf16.mxu0 %v1964_v17 }
 0x1de   :  { %2384 = vmatmul.mubr.bf16.vlgmr.msra.gmra.mrb[4].mxu0 %v1963_v13 }
 0x1df   :  { %2395 = vmatpush1.bf16.msra.mxu0 %v3607_v19  ;;  %2426 = vmatprep.mubr.bf16.mxu0 %v1966_v18 }
 0x1e0   :  { %2396 = vmatprep.subr.bf16.mxu0 %v3612_v14 }
 0x1e3   :  { %2397 = vmatpush1.bf16.msra.mxu0 %v3610_v15  ;;  %v3085_v15 = vld [vmem:[%s4822_s6] ss:$0 sm:$0xff] }
 0x1e4   :  { %2398 = vmatprep.subr.bf16.mxu0 %v3615_v20 }
 0x1e7   :  { %2399 = vmatpush1.bf16.msra.mxu0 %v3613_v21 }
 0x1e8   :  { %2400 = vmatprep.subr.bf16.mxu0 %v3618_v22 }
 0x1eb   :  { %2401 = vmatpush1.bf16.msra.mxu0 %v3616_v23 }
 0x1ec   :  { %2402 = vmatprep.subr.bf16.mxu0 %v3621_v24 }
 0x1ef   :  { %2403 = vmatpush1.bf16.msra.mxu0 %v3619_v25 }
 0x1f0   :  { %2404 = vmatprep.subr.bf16.mxu0 %v3624_v26 }
 0x1f3   :  { %2405 = vmatpush1.bf16.msra.mxu0 %v3622_v27 }
 0x1f4   :  { %2406 = vmatprep.subr.bf16.mxu0 %v3627_v28 }
 0x1f7   :  { %2407 = vmatpush1.bf16.msra.mxu0 %v3625_v29 }
 0x1f8   :  { %2408 = vmatprep.subr.bf16.mxu0 %v3630_v30 }
 0x1fb   :  { %2409 = vmatpush1.bf16.msra.mxu0 %v3628_v31 }
 0x1fc   :  { %2410 = vmatprep.subr.bf16.mxu0 %v3633_v32 }
 0x1ff   :  { %2411 = vmatpush1.bf16.msra.mxu0 %v3631_v33 }
 0x200   :  { %2412 = vmatprep.subr.bf16.mxu0 %v3636_v34 }
 0x203   :  { %2413 = vmatpush1.bf16.msra.mxu0 %v3634_v35 }
 0x204   :  { %2414 = vmatprep.subr.bf16.mxu0 %v3639_v36 }
 0x207   :  { %2415 = vmatpush1.bf16.msra.mxu0 %v3637_v37 }
 0x208   :  { %2416 = vmatprep.subr.bf16.mxu0 %v3642_v38 }
 0x20b   :  { %2417 = vmatpush1.bf16.msra.mxu0 %v3640_v39 }
 0x20c   :  { %2418 = vmatprep.subr.bf16.mxu0 %v3645_v40 }
 0x20f   :  { %2419 = vmatpush1.bf16.msra.mxu0 %v3643_v41 }
 0x210   :  { %2420 = vmatprep.subr.bf16.mxu0 %v3648_v42 }
 0x213   :  { %2421 = vmatpush1.bf16.msra.mxu0 %v3646_v43 }
 0x214   :  { %2422 = vmatprep.subr.bf16.mxu0 %v3651_v44 }
 0x217   :  { %2423 = vmatpush1.bf16.msra.mxu0 %v3649_v45 }
 0x218   :  { %2424 = vmatprep.subr.bf16.mxu0 %v3654_v46 }
 0x21b   :  { %2425 = vmatpush1.bf16.msra.mxu0 %v3652_v47 }
 0x21e   :  { %2427 = vmatmul.mubr.bf16.vlgmr.msra.gmra.mrb[4].mxu0 %v4672_v16 }
 0x2f1   :  { %v2428_v53 = vpop.f32.mrb[4].mxu0 }
 0x2f2   :  { %v2430_v54 = vpop.f32.mrb[5].mxu0  ;;  %v2437_v56 = vmax.f32 %v2428_v53, 0.0 }
 0x2f3   :  { %v2432_v55 = vpop.f32.mrb[6].mxu0  ;;  %v2438_v59 = vmax.f32 %v2430_v54, 0.0 }
 0x2f4   :  { %v2439_v57 = vmax.f32 %v2432_v55, 0.0  ;;  %v2434_v58 = vpop.f32.mrb[7].mxu0 }
 0x2f5   :  { %v2440_v60 = vmax.f32 %v2434_v58, 0.0 }
 0x2f6   :  { %v2441_v61 = vpack.c.bf16 %v2439_v57, %v2437_v56 }
 0x2f7   :  { %v2442_v62 = vpack.c.bf16 %v2440_v60, %v2438_v59 }
 0x2f9   :  { %2610 = vmatprep.mubr.bf16.mxu1 %v2442_v62 }
 0x2fa   :  { %2611 = vmatmul.mubr.bf16.vlgmr.msra.gmra.mrb[4].mxu1 %v2441_v61 }
 0x2fb   :  { %3126 = vmatpush3.bf16.msra.mxu1 %v3671_v63  ;;  %3141 = vmatprep.mubr.msk.bf16.mxu1 %vm3680_vm0, %v3679_v52 }
 0x2fc   :  { %3127 = vmatprep.subr.bf16.mxu1 %v3679_v52 }
 0x2ff   :  { %3128 = vmatpush3.bf16.msra.mxu1 %v3672_v0 }
 0x300   :  { %3129 = vmatprep.subr.bf16.mxu1 %v3679_v52 }
 0x303   :  { %3130 = vmatpush3.bf16.msra.mxu1 %v3673_v1 }
 0x304   :  { %3131 = vmatprep.subr.bf16.mxu1 %v3679_v52 }
 0x307   :  { %3132 = vmatpush3.bf16.msra.mxu1 %v3674_v2 }
 0x308   :  { %3133 = vmatprep.subr.bf16.mxu1 %v3679_v52 }
 0x30b   :  { %3134 = vmatpush3.bf16.msra.mxu1 %v3675_v3 }
 0x30c   :  { %3135 = vmatprep.subr.bf16.mxu1 %v3679_v52 }
 0x30f   :  { %3136 = vmatpush3.bf16.msra.mxu1 %v3676_v4 }
 0x310   :  { %3137 = vmatprep.subr.bf16.mxu1 %v3679_v52 }
 0x313   :  { %3138 = vmatpush3.bf16.msra.mxu1 %v3677_v5 }
 0x314   :  { %3139 = vmatprep.subr.bf16.mxu1 %v3679_v52 }
 0x317   :  { %3140 = vmatpush3.bf16.msra.mxu1 %v3678_v6 }
 0x3cd   :  { %v3110_v7 = vpop.f32.mrb[4].mxu1 }
 0x3ce   :  { %v3111_v9 = vpop.f32.mrb[5].mxu1 }
 0x3cf   :  { %v3112_v10 = vadd.f32 %v3111_v9, %v3110_v7  ;;  %v3113_v11 = vpop.f32.mrb[6].mxu1 }
 0x3d0   :  { %v3114_v12 = vpop.f32.mrb[7].mxu1 }
 0x3d1   :  { %v2613_v13 = vadd.f32 %v3112_v10, %v3068_v8  ;;  %v3115_v16 = vadd.f32 %v3114_v12, %v3113_v11 }
 0x3d3   :  { %v2616_v17 = vadd.f32 %v3115_v16, %v3068_v8  ;;  %v2619_v18 = vmax.f32 %v2613_v13, 0.0 }
 0x3d5   :  { %v2620_v19 = vmax.f32 %v2616_v17, 0.0 }
 0x3d7   :  { %v2621_v14 = vpack.c.bf16 %v2620_v19, %v2619_v18 }
 0x3d9   :  { %3142 = vmatmul.mubr.bf16.vlgmr.msra.gmra.mrb[8].mxu1 %v2621_v14 }
 0x4ac   :  { %v2727_v20 = vpop.f32.mrb[8].mxu1 }
 0x4ad   :  { %v2728_v21 = vadd.f32 %v3085_v15, %v2727_v20  ;;  %v3143_v22 = vpop.f32.mrb[9].mxu1 }
 0x4ae   :  { %v2730_v23 = vpop.f32.mrb[10].mxu1 }
 0x4af   :  { %2734 = vst [vmem:[%s4823_s7] sm:$0xff] %v2728_v21  ;;  %v2731_v24 = vadd.f32 %v3085_v15, %v2730_v23  ;;  %v3144_v25 = vpop.f32.mrb[11].mxu1 }
 0x4b1   :  { %2735 = vst [vmem:[%s4823_s7 + $0x8] sm:$0xff] %v2731_v24 }

</bundles_post_ra>
